<compile_context>
chip_gen: v7x
topology: tpu7x:2x2x1
jax: 0.10.0
libtpu: 0.0.40
codegen_flags: <defaults>
</compile_context>

<pallas_src>
import math
import jax
import jax.numpy as jnp
from jax import lax
from jax.experimental import pallas as pl
from jax.experimental.pallas import tpu as pltpu

# ---- small synthetic CLIP-text config (analogue of clip-vit-large-patch14) ----
B = 2            # batch
S = 16           # max_length (small analogue of 77)
D = 128          # hidden size (lane-dense; small analogue of 768)
H = 4            # attention heads
HD = D // H      # head dim
FFN = 4 * D      # mlp intermediate size
N_LAYERS = 2     # small analogue of 12
VOCAB = 1000
EPS = 1e-5       # CLIP layer_norm_eps


def _layernorm(x, gamma, beta):
    # x: (R, D); gamma/beta: (1, D); all f32
    mean = jnp.mean(x, axis=-1, keepdims=True)
    var = jnp.mean(jnp.square(x - mean), axis=-1, keepdims=True)
    return (x - mean) * lax.rsqrt(var + EPS) * gamma + beta


def clip_stack_kernel(x_in_ref, bias_ref,
                      ln1_g_ref, ln1_b_ref,
                      wqkv_ref, bqkv_ref,
                      wo_ref, bo_ref,
                      ln2_g_ref, ln2_b_ref,
                      w1_ref, b1_ref, w2_ref, b2_ref,
                      fin_g_ref, fin_b_ref,
                      out_ref,
                      x_scr, ctx_scr):
    """All CLIP encoder layers (grid axis 0 = layer) + final LayerNorm.

    Activation carried across layers in x_scr (VMEM, (B*S, D), f32)."""
    l = pl.program_id(0)
    last = pl.num_programs(0) - 1

    # ---- init: load embeddings into the resident activation at layer 0 ----
    @pl.when(l == 0)
    def _():
        x_scr[...] = x_in_ref[...].reshape(B * S, D)

    x = x_scr[...]                                          # (B*S, D) f32

    # ================= self-attention block (pre-LN, causal) =================
    h = _layernorm(x, ln1_g_ref[0], ln1_b_ref[0])

    # one wide, lane-dense QKV projection (bf16 MXU, f32 accumulation)
    qkv = jnp.dot(h.astype(jnp.bfloat16), wqkv_ref[0],
                  preferred_element_type=jnp.float32) + bqkv_ref[0]   # (B*S, 3D)

    scale = jnp.float32(1.0 / math.sqrt(HD))
    q3 = (qkv[:, 0 * D:1 * D] * scale).reshape(B, S, D)     # CLIP scales q after bias
    k3 = qkv[:, 1 * D:2 * D].reshape(B, S, D)
    v3 = qkv[:, 2 * D:3 * D].reshape(B, S, D)

    causal_bias = bias_ref[...]                             # (1, S, S) additive, resident

    for hh in range(H):                                     # static loop, H=4
        sl = slice(hh * HD, (hh + 1) * HD)
        qh = q3[:, :, sl].astype(jnp.bfloat16)              # (B, S, HD)
        kh = k3[:, :, sl].astype(jnp.bfloat16)
        vh = v3[:, :, sl].astype(jnp.bfloat16)

        # batch-batched dot_general, no explicit transpose
        s = jnp.einsum('bqd,bkd->bqk', qh, kh,
                       preferred_element_type=jnp.float32) + causal_bias  # (B, S, S)
        m = jnp.max(s, axis=-1, keepdims=True)
        e = jnp.exp(s - m)
        denom = jnp.sum(e, axis=-1, keepdims=True)
        p = e * pl.reciprocal(denom, approx=True)           # EUP, not VALU divide

        ctxh = jnp.einsum('bqk,bkd->bqd', p.astype(jnp.bfloat16), vh,
                          preferred_element_type=jnp.float32)            # (B, S, HD)
        # write head slice straight into the VMEM ctx scratch (no concatenate)
        ctx_scr[:, sl] = ctxh.reshape(B * S, HD)

    attn_out = jnp.dot(ctx_scr[...].astype(jnp.bfloat16), wo_ref[0],
                       preferred_element_type=jnp.float32) + bo_ref[0]
    x = x + attn_out

    # ========================= MLP block (quick-GELU) ========================
    h2 = _layernorm(x, ln2_g_ref[0], ln2_b_ref[0])
    hid = jnp.dot(h2.astype(jnp.bfloat16), w1_ref[0],
                  preferred_element_type=jnp.float32) + b1_ref[0]        # (B*S, FFN)
    hid = hid * jax.nn.sigmoid(1.702 * hid)                              # quick_gelu
    mlp_out = jnp.dot(hid.astype(jnp.bfloat16), w2_ref[0],
                      preferred_element_type=jnp.float32) + b2_ref[0]
    x = x + mlp_out

    # carry activation to the next layer step
    x_scr[...] = x

    # ---- finalize: final LayerNorm -> last_hidden_state on the last layer ----
    @pl.when(l == last)
    def _():
        out_ref[...] = _layernorm(x, fin_g_ref[...], fin_b_ref[...]).reshape(B, S, D)


def run_clip_text_encoder(x_emb, params):
    """x_emb: (B, S, D) f32 token+pos embeddings -> (B, S, D) last_hidden_state."""
    layer_weight_names = ["ln1_g", "ln1_b", "wqkv", "bqkv", "wo", "bo",
                          "ln2_g", "ln2_b", "w1", "b1", "w2", "b2"]
    layer_weights = [params[n] for n in layer_weight_names]

    # additive causal bias, built once and kept resident across the layer loop
    row = lax.broadcasted_iota(jnp.int32, (S, S), 0)
    col = lax.broadcasted_iota(jnp.int32, (S, S), 1)
    causal_bias = jnp.where(col <= row, 0.0, -1e9).astype(jnp.float32)[None]   # (1,S,S)

    def layer_spec(arr):
        # one layer's slice per grid step; indexed by the layer id
        nrest = arr.ndim - 1
        return pl.BlockSpec((1,) + arr.shape[1:],
                            lambda l, _n=nrest: (l,) + (0,) * _n)

    def full_spec(arr):
        # whole array, resident across the layer axis (constant block index -> one DMA)
        return pl.BlockSpec(arr.shape, lambda l, _n=arr.ndim: (0,) * _n)

    return pl.pallas_call(
        clip_stack_kernel,
        out_shape=jax.ShapeDtypeStruct((B, S, D), jnp.float32),
        grid=(N_LAYERS,),
        in_specs=([full_spec(x_emb), full_spec(causal_bias)]
                  + [layer_spec(w) for w in layer_weights]
                  + [full_spec(params["final_g"]), full_spec(params["final_b"])]),
        out_specs=pl.BlockSpec((B, S, D), lambda l: (0, 0, 0)),
        scratch_shapes=[pltpu.VMEM((B * S, D), jnp.float32),   # resident activation
                        pltpu.VMEM((B * S, D), jnp.float32)],  # per-layer attn context
        compiler_params=pltpu.CompilerParams(
            # layer axis carries a sequential dependency through the scratch
            dimension_semantics=("arbitrary",),
            # raise scoped VMEM above the 16/32 MiB defaults (matters at real CLIP scale)
            vmem_limit_bytes=48 * 1024 * 1024,
        ),
    )(x_emb, causal_bias, *layer_weights, params["final_g"], params["final_b"])


def init_params(key):
    std = 0.02
    keys = iter(jax.random.split(key, 8))
    bf16 = jnp.bfloat16

    def rand(k, shape):
        return jax.random.normal(k, shape, jnp.float32) * std

    params = {
        "tok_emb": rand(next(keys), (VOCAB, D)),
        "pos_emb": rand(next(keys), (S, D)),
        "final_g": jnp.ones((1, D), jnp.float32),
        "final_b": jnp.zeros((1, D), jnp.float32),
        # per-layer weights stacked with a leading layer axis
        "ln1_g": jnp.ones((N_LAYERS, 1, D), jnp.float32),
        "ln1_b": jnp.zeros((N_LAYERS, 1, D), jnp.float32),
        "wqkv": rand(next(keys), (N_LAYERS, D, 3 * D)).astype(bf16),   # fused q|k|v
        "bqkv": jnp.zeros((N_LAYERS, 1, 3 * D), jnp.float32),
        "wo": rand(next(keys), (N_LAYERS, D, D)).astype(bf16),
        "bo": jnp.zeros((N_LAYERS, 1, D), jnp.float32),
        "ln2_g": jnp.ones((N_LAYERS, 1, D), jnp.float32),
        "ln2_b": jnp.zeros((N_LAYERS, 1, D), jnp.float32),
        "w1": rand(next(keys), (N_LAYERS, D, FFN)).astype(bf16),
        "b1": jnp.zeros((N_LAYERS, 1, FFN), jnp.float32),
        "w2": rand(next(keys), (N_LAYERS, FFN, D)).astype(bf16),
        "b2": jnp.zeros((N_LAYERS, 1, D), jnp.float32),
    }
    return params


def frozen_clip_embedder_forward(tokens, params):
    """Equivalent of FrozenCLIPEmbedder.forward with layer='last':
    returns last_hidden_state of shape (B, S, D)."""
    # embeddings (glue: gather in plain JAX)
    x = jnp.take(params["tok_emb"], tokens, axis=0) + params["pos_emb"][None]  # (B,S,D)
    # fused transformer encoder stack + final LayerNorm (single Pallas kernel)
    return run_clip_text_encoder(x, params)


if __name__ == "__main__":
    key = jax.random.PRNGKey(0)
    k_tok, k_par = jax.random.split(key)

    # synthetic token ids (stand-in for CLIPTokenizer output, padded to max_length)
    tokens = jax.random.randint(k_tok, (B, S), 0, VOCAB, dtype=jnp.int32)
    params = init_params(k_par)

    z = jax.jit(frozen_clip_embedder_forward)(tokens, params)
    z = jax.block_until_ready(z)

    assert z.shape == (B, S, D), z.shape
    assert bool(jnp.all(jnp.isfinite(z))), "non-finite output"
    print("KERNEL_OK")
</pallas_src>

<mosaic_0001>
module attributes {stable_mosaic.version = 11 : i64} {
  func.func @clip_stack_kernel(%arg0: i32, %arg1: memref<2x16x128xf32, #tpu.memory_space<vmem>>, %arg2: memref<1x16x16xf32, #tpu.memory_space<vmem>>, %arg3: memref<1x1x128xf32, #tpu.memory_space<vmem>>, %arg4: memref<1x1x128xf32, #tpu.memory_space<vmem>>, %arg5: memref<1x128x384xbf16, #tpu.memory_space<vmem>>, %arg6: memref<1x1x384xf32, #tpu.memory_space<vmem>>, %arg7: memref<1x128x128xbf16, #tpu.memory_space<vmem>>, %arg8: memref<1x1x128xf32, #tpu.memory_space<vmem>>, %arg9: memref<1x1x128xf32, #tpu.memory_space<vmem>>, %arg10: memref<1x1x128xf32, #tpu.memory_space<vmem>>, %arg11: memref<1x128x512xbf16, #tpu.memory_space<vmem>>, %arg12: memref<1x1x512xf32, #tpu.memory_space<vmem>>, %arg13: memref<1x512x128xbf16, #tpu.memory_space<vmem>>, %arg14: memref<1x1x128xf32, #tpu.memory_space<vmem>>, %arg15: memref<1x128xf32, #tpu.memory_space<vmem>>, %arg16: memref<1x128xf32, #tpu.memory_space<vmem>>, %arg17: memref<2x16x128xf32, #tpu.memory_space<vmem>>, %arg18: memref<32x128xf32, #tpu.memory_space<vmem>>, %arg19: memref<32x128xf32, #tpu.memory_space<vmem>>) attributes {dimension_semantics = [#tpu.dimension_semantics<arbitrary>], iteration_bounds = array<i64: 2>, scalar_prefetch = 0 : i64, scratch_operands = 2 : i64, tpu.core_type = #tpu.core_type<tc>, window_params = [{pipeline_mode = #tpu.pipeline_mode<synchronous>, transform_indices = @transform_0, window_bounds = array<i64: 2, 16, 128>}, {pipeline_mode = #tpu.pipeline_mode<synchronous>, transform_indices = @transform_1, window_bounds = array<i64: 1, 16, 16>}, {transform_indices = @transform_2, window_bounds = array<i64: 1, 1, 128>}, {transform_indices = @transform_3, window_bounds = array<i64: 1, 1, 128>}, {transform_indices = @transform_4, window_bounds = array<i64: 1, 128, 384>}, {transform_indices = @transform_5, window_bounds = array<i64: 1, 1, 384>}, {transform_indices = @transform_6, window_bounds = array<i64: 1, 128, 128>}, {transform_indices = @transform_7, window_bounds = array<i64: 1, 1, 128>}, {transform_indices = @transform_8, window_bounds = array<i64: 1, 1, 128>}, {transform_indices = @transform_9, window_bounds = array<i64: 1, 1, 128>}, {transform_indices = @transform_10, window_bounds = array<i64: 1, 128, 512>}, {transform_indices = @transform_11, window_bounds = array<i64: 1, 1, 512>}, {transform_indices = @transform_12, window_bounds = array<i64: 1, 512, 128>}, {transform_indices = @transform_13, window_bounds = array<i64: 1, 1, 128>}, {pipeline_mode = #tpu.pipeline_mode<synchronous>, transform_indices = @transform_14, window_bounds = array<i64: 1, 128>}, {pipeline_mode = #tpu.pipeline_mode<synchronous>, transform_indices = @transform_15, window_bounds = array<i64: 1, 128>}, {pipeline_mode = #tpu.pipeline_mode<synchronous>, transform_indices = @transform_16, window_bounds = array<i64: 2, 16, 128>}]} {
    %c0_i32 = arith.constant 0 : i32
    %0 = arith.cmpi eq, %arg0, %c0_i32 : i32
    %1 = arith.extui %0 : i1 to i32
    %c0_i32_0 = arith.constant 0 : i32
    %2 = arith.cmpi ne, %1, %c0_i32_0 : i32
    scf.if %2 {
      %c0_83 = arith.constant 0 : index
      %c0_84 = arith.constant 0 : index
      %c0_85 = arith.constant 0 : index
      %204 = vector.load %arg1[%c0_83, %c0_84, %c0_85] : memref<2x16x128xf32, #tpu.memory_space<vmem>>, vector<2x16x128xf32>
      %205 = vector.shape_cast %204 : vector<2x16x128xf32> to vector<32x128xf32>
      %c0_86 = arith.constant 0 : index
      %c0_87 = arith.constant 0 : index
      %206 = vector.load %arg18[%c0_86, %c0_87] : memref<32x128xf32, #tpu.memory_space<vmem>>, vector<32x128xf32>
      tpu.vector_store %arg18[%c0_86, %c0_87], %205 {strides = array<i32>} : memref<32x128xf32, #tpu.memory_space<vmem>>, vector<32x128xf32>,
    } else {
    }
    %c0 = arith.constant 0 : index
    %c0_1 = arith.constant 0 : index
    %3 = vector.load %arg18[%c0, %c0_1] : memref<32x128xf32, #tpu.memory_space<vmem>>, vector<32x128xf32>
    %c0_2 = arith.constant 0 : index
    %c0_3 = arith.constant 0 : index
    %c0_4 = arith.constant 0 : index
    %4 = vector.load %arg3[%c0_2, %c0_3, %c0_4] : memref<1x1x128xf32, #tpu.memory_space<vmem>>, vector<1x1x128xf32>
    %5 = vector.shape_cast %4 : vector<1x1x128xf32> to vector<1x128xf32>
    %c0_5 = arith.constant 0 : index
    %c0_6 = arith.constant 0 : index
    %c0_7 = arith.constant 0 : index
    %6 = vector.load %arg4[%c0_5, %c0_6, %c0_7] : memref<1x1x128xf32, #tpu.memory_space<vmem>>, vector<1x1x128xf32>
    %7 = vector.shape_cast %6 : vector<1x1x128xf32> to vector<1x128xf32>
    %cst = arith.constant dense<0.000000e+00> : vector<32xf32>
    %8 = vector.multi_reduction <add>, %3, %cst [1] : vector<32x128xf32> to vector<32xf32>
    %9 = vector.shape_cast %8 : vector<32xf32> to vector<32x1xf32>
    %cst_8 = arith.constant 1.280000e+02 : f32
    %10 = vector.broadcast %cst_8 : f32 to vector<32x1xf32>
    %11 = arith.divf %9, %10 : vector<32x1xf32>
    %12 = vector.broadcast %11 : vector<32x1xf32> to vector<32x128xf32>
    %13 = arith.subf %3, %12 : vector<32x128xf32>
    %14 = arith.mulf %13, %13 : vector<32x128xf32>
    %cst_9 = arith.constant dense<0.000000e+00> : vector<32xf32>
    %15 = vector.multi_reduction <add>, %14, %cst_9 [1] : vector<32x128xf32> to vector<32xf32>
    %16 = vector.shape_cast %15 : vector<32xf32> to vector<32x1xf32>
    %cst_10 = arith.constant 1.280000e+02 : f32
    %17 = vector.broadcast %cst_10 : f32 to vector<32x1xf32>
    %18 = arith.divf %16, %17 : vector<32x1xf32>
    %19 = vector.broadcast %11 : vector<32x1xf32> to vector<32x128xf32>
    %20 = arith.subf %3, %19 : vector<32x128xf32>
    %cst_11 = arith.constant 9.99999974E-6 : f32
    %21 = vector.broadcast %cst_11 : f32 to vector<32x1xf32>
    %22 = arith.addf %18, %21 : vector<32x1xf32>
    %23 = math.rsqrt %22 : vector<32x1xf32>
    %24 = vector.broadcast %23 : vector<32x1xf32> to vector<32x128xf32>
    %25 = arith.mulf %20, %24 : vector<32x128xf32>
    %26 = vector.broadcast %5 : vector<1x128xf32> to vector<32x128xf32>
    %27 = arith.mulf %25, %26 : vector<32x128xf32>
    %28 = vector.broadcast %7 : vector<1x128xf32> to vector<32x128xf32>
    %29 = arith.addf %27, %28 : vector<32x128xf32>
    %30 = arith.truncf %29 : vector<32x128xf32> to vector<32x128xbf16>
    %c0_12 = arith.constant 0 : index
    %c0_13 = arith.constant 0 : index
    %c0_14 = arith.constant 0 : index
    %31 = vector.load %arg5[%c0_12, %c0_13, %c0_14] : memref<1x128x384xbf16, #tpu.memory_space<vmem>>, vector<1x128x384xbf16>
    %32 = vector.shape_cast %31 : vector<1x128x384xbf16> to vector<128x384xbf16>
    %cst_15 = arith.constant dense<0.000000e+00> : vector<32x384xf32>
    %33 = tpu.matmul %30, %32, %cst_15 {dimension_numbers = #tpu.dot_dimension_numbers<[1], [0], [0], [1], [0, 0, 1, 1], [], []>} : vector<32x128xbf16>, vector<128x384xbf16>, vector<32x384xf32> -> vector<32x384xf32>
    %c0_16 = arith.constant 0 : index
    %c0_17 = arith.constant 0 : index
    %c0_18 = arith.constant 0 : index
    %34 = vector.load %arg6[%c0_16, %c0_17, %c0_18] : memref<1x1x384xf32, #tpu.memory_space<vmem>>, vector<1x1x384xf32>
    %35 = vector.shape_cast %34 : vector<1x1x384xf32> to vector<1x384xf32>
    %36 = vector.broadcast %35 : vector<1x384xf32> to vector<32x384xf32>
    %37 = arith.addf %33, %36 : vector<32x384xf32>
    %38 = vector.extract_strided_slice %37 {offsets = [0, 0], sizes = [32, 128], strides = [1, 1]} : vector<32x384xf32> to vector<32x128xf32>
    %cst_19 = arith.constant 0.176776692 : f32
    %39 = vector.broadcast %cst_19 : f32 to vector<32x128xf32>
    %40 = arith.mulf %38, %39 : vector<32x128xf32>
    %41 = vector.shape_cast %40 : vector<32x128xf32> to vector<2x16x128xf32>
    %42 = vector.extract_strided_slice %37 {offsets = [0, 128], sizes = [32, 128], strides = [1, 1]} : vector<32x384xf32> to vector<32x128xf32>
    %43 = vector.shape_cast %42 : vector<32x128xf32> to vector<2x16x128xf32>
    %44 = vector.extract_strided_slice %37 {offsets = [0, 256], sizes = [32, 128], strides = [1, 1]} : vector<32x384xf32> to vector<32x128xf32>
    %45 = vector.shape_cast %44 : vector<32x128xf32> to vector<2x16x128xf32>
    %c0_20 = arith.constant 0 : index
    %c0_21 = arith.constant 0 : index
    %c0_22 = arith.constant 0 : index
    %46 = vector.load %arg2[%c0_20, %c0_21, %c0_22] : memref<1x16x16xf32, #tpu.memory_space<vmem>>, vector<1x16x16xf32>
    %47 = vector.extract_strided_slice %41 {offsets = [0, 0, 0], sizes = [2, 16, 32], strides = [1, 1, 1]} : vector<2x16x128xf32> to vector<2x16x32xf32>
    %48 = arith.truncf %47 : vector<2x16x32xf32> to vector<2x16x32xbf16>
    %49 = vector.extract_strided_slice %43 {offsets = [0, 0, 0], sizes = [2, 16, 32], strides = [1, 1, 1]} : vector<2x16x128xf32> to vector<2x16x32xf32>
    %50 = arith.truncf %49 : vector<2x16x32xf32> to vector<2x16x32xbf16>
    %51 = vector.extract_strided_slice %45 {offsets = [0, 0, 0], sizes = [2, 16, 32], strides = [1, 1, 1]} : vector<2x16x128xf32> to vector<2x16x32xf32>
    %52 = arith.truncf %51 : vector<2x16x32xf32> to vector<2x16x32xbf16>
    "tpu.trace_start"() <{level = 10 : i32, message = "bqd,bkd->bqk"}> : () -> ()
    %cst_23 = arith.constant dense<0.000000e+00> : vector<2x16x16xf32>
    %53 = tpu.matmul %48, %50, %cst_23 {dimension_numbers = #tpu.dot_dimension_numbers<[2], [2], [1], [1], [0, 0, 0, 1, 1, 1], [0], [0]>} : vector<2x16x32xbf16>, vector<2x16x32xbf16>, vector<2x16x16xf32> -> vector<2x16x16xf32>
    "tpu.trace_stop"() : () -> ()
    %54 = vector.broadcast %46 : vector<1x16x16xf32> to vector<2x16x16xf32>
    %55 = arith.addf %53, %54 : vector<2x16x16xf32>
    %cst_24 = arith.constant dense<0xFF800000> : vector<2x16xf32>
    %56 = vector.multi_reduction <maximumf>, %55, %cst_24 [2] : vector<2x16x16xf32> to vector<2x16xf32>
    %57 = vector.shape_cast %56 : vector<2x16xf32> to vector<2x16x1xf32>
    %58 = vector.broadcast %57 : vector<2x16x1xf32> to vector<2x16x16xf32>
    %59 = arith.subf %55, %58 : vector<2x16x16xf32>
    %60 = math.exp %59 : vector<2x16x16xf32>
    %cst_25 = arith.constant dense<0.000000e+00> : vector<2x16xf32>
    %61 = vector.multi_reduction <add>, %60, %cst_25 [2] : vector<2x16x16xf32> to vector<2x16xf32>
    %62 = vector.shape_cast %61 : vector<2x16xf32> to vector<2x16x1xf32>
    %63 = tpu.reciprocal %62 {approx = true} : vector<2x16x1xf32> -> vector<2x16x1xf32>
    %64 = vector.broadcast %63 : vector<2x16x1xf32> to vector<2x16x16xf32>
    %65 = arith.mulf %60, %64 : vector<2x16x16xf32>
    %66 = arith.truncf %65 : vector<2x16x16xf32> to vector<2x16x16xbf16>
    "tpu.trace_start"() <{level = 10 : i32, message = "bqk,bkd->bqd"}> : () -> ()
    %cst_26 = arith.constant dense<0.000000e+00> : vector<2x16x32xf32>
    %67 = tpu.matmul %66, %52, %cst_26 {dimension_numbers = #tpu.dot_dimension_numbers<[2], [1], [1], [2], [0, 0, 0, 1, 1, 2], [0], [0]>} : vector<2x16x16xbf16>, vector<2x16x32xbf16>, vector<2x16x32xf32> -> vector<2x16x32xf32>
    "tpu.trace_stop"() : () -> ()
    %68 = vector.shape_cast %67 : vector<2x16x32xf32> to vector<32x32xf32>
    %c0_27 = arith.constant 0 : index
    %c0_28 = arith.constant 0 : index
    %69 = vector.load %arg19[%c0_27, %c0_28] : memref<32x128xf32, #tpu.memory_space<vmem>>, vector<32x32xf32>
    tpu.vector_store %arg19[%c0_27, %c0_28], %68 {strides = array<i32>} : memref<32x128xf32, #tpu.memory_space<vmem>>, vector<32x32xf32>,
    %70 = vector.extract_strided_slice %41 {offsets = [0, 0, 32], sizes = [2, 16, 32], strides = [1, 1, 1]} : vector<2x16x128xf32> to vector<2x16x32xf32>
    %71 = arith.truncf %70 : vector<2x16x32xf32> to vector<2x16x32xbf16>
    %72 = vector.extract_strided_slice %43 {offsets = [0, 0, 32], sizes = [2, 16, 32], strides = [1, 1, 1]} : vector<2x16x128xf32> to vector<2x16x32xf32>
    %73 = arith.truncf %72 : vector<2x16x32xf32> to vector<2x16x32xbf16>
    %74 = vector.extract_strided_slice %45 {offsets = [0, 0, 32], sizes = [2, 16, 32], strides = [1, 1, 1]} : vector<2x16x128xf32> to vector<2x16x32xf32>
    %75 = arith.truncf %74 : vector<2x16x32xf32> to vector<2x16x32xbf16>
    "tpu.trace_start"() <{level = 10 : i32, message = "bqd,bkd->bqk"}> : () -> ()
    %cst_29 = arith.constant dense<0.000000e+00> : vector<2x16x16xf32>
    %76 = tpu.matmul %71, %73, %cst_29 {dimension_numbers = #tpu.dot_dimension_numbers<[2], [2], [1], [1], [0, 0, 0, 1, 1, 1], [0], [0]>} : vector<2x16x32xbf16>, vector<2x16x32xbf16>, vector<2x16x16xf32> -> vector<2x16x16xf32>
    "tpu.trace_stop"() : () -> ()
    %77 = vector.broadcast %46 : vector<1x16x16xf32> to vector<2x16x16xf32>
    %78 = arith.addf %76, %77 : vector<2x16x16xf32>
    %cst_30 = arith.constant dense<0xFF800000> : vector<2x16xf32>
    %79 = vector.multi_reduction <maximumf>, %78, %cst_30 [2] : vector<2x16x16xf32> to vector<2x16xf32>
    %80 = vector.shape_cast %79 : vector<2x16xf32> to vector<2x16x1xf32>
    %81 = vector.broadcast %80 : vector<2x16x1xf32> to vector<2x16x16xf32>
    %82 = arith.subf %78, %81 : vector<2x16x16xf32>
    %83 = math.exp %82 : vector<2x16x16xf32>
    %cst_31 = arith.constant dense<0.000000e+00> : vector<2x16xf32>
    %84 = vector.multi_reduction <add>, %83, %cst_31 [2] : vector<2x16x16xf32> to vector<2x16xf32>
    %85 = vector.shape_cast %84 : vector<2x16xf32> to vector<2x16x1xf32>
    %86 = tpu.reciprocal %85 {approx = true} : vector<2x16x1xf32> -> vector<2x16x1xf32>
    %87 = vector.broadcast %86 : vector<2x16x1xf32> to vector<2x16x16xf32>
    %88 = arith.mulf %83, %87 : vector<2x16x16xf32>
    %89 = arith.truncf %88 : vector<2x16x16xf32> to vector<2x16x16xbf16>
    "tpu.trace_start"() <{level = 10 : i32, message = "bqk,bkd->bqd"}> : () -> ()
    %cst_32 = arith.constant dense<0.000000e+00> : vector<2x16x32xf32>
    %90 = tpu.matmul %89, %75, %cst_32 {dimension_numbers = #tpu.dot_dimension_numbers<[2], [1], [1], [2], [0, 0, 0, 1, 1, 2], [0], [0]>} : vector<2x16x16xbf16>, vector<2x16x32xbf16>, vector<2x16x32xf32> -> vector<2x16x32xf32>
    "tpu.trace_stop"() : () -> ()
    %91 = vector.shape_cast %90 : vector<2x16x32xf32> to vector<32x32xf32>
    %c0_33 = arith.constant 0 : index
    %c32 = arith.constant 32 : index
    %92 = vector.load %arg19[%c0_33, %c32] : memref<32x128xf32, #tpu.memory_space<vmem>>, vector<32x32xf32>
    tpu.vector_store %arg19[%c0_33, %c32], %91 {strides = array<i32>} : memref<32x128xf32, #tpu.memory_space<vmem>>, vector<32x32xf32>,
    %93 = vector.extract_strided_slice %41 {offsets = [0, 0, 64], sizes = [2, 16, 32], strides = [1, 1, 1]} : vector<2x16x128xf32> to vector<2x16x32xf32>
    %94 = arith.truncf %93 : vector<2x16x32xf32> to vector<2x16x32xbf16>
    %95 = vector.extract_strided_slice %43 {offsets = [0, 0, 64], sizes = [2, 16, 32], strides = [1, 1, 1]} : vector<2x16x128xf32> to vector<2x16x32xf32>
    %96 = arith.truncf %95 : vector<2x16x32xf32> to vector<2x16x32xbf16>
    %97 = vector.extract_strided_slice %45 {offsets = [0, 0, 64], sizes = [2, 16, 32], strides = [1, 1, 1]} : vector<2x16x128xf32> to vector<2x16x32xf32>
    %98 = arith.truncf %97 : vector<2x16x32xf32> to vector<2x16x32xbf16>
    "tpu.trace_start"() <{level = 10 : i32, message = "bqd,bkd->bqk"}> : () -> ()
    %cst_34 = arith.constant dense<0.000000e+00> : vector<2x16x16xf32>
    %99 = tpu.matmul %94, %96, %cst_34 {dimension_numbers = #tpu.dot_dimension_numbers<[2], [2], [1], [1], [0, 0, 0, 1, 1, 1], [0], [0]>} : vector<2x16x32xbf16>, vector<2x16x32xbf16>, vector<2x16x16xf32> -> vector<2x16x16xf32>
    "tpu.trace_stop"() : () -> ()
    %100 = vector.broadcast %46 : vector<1x16x16xf32> to vector<2x16x16xf32>
    %101 = arith.addf %99, %100 : vector<2x16x16xf32>
    %cst_35 = arith.constant dense<0xFF800000> : vector<2x16xf32>
    %102 = vector.multi_reduction <maximumf>, %101, %cst_35 [2] : vector<2x16x16xf32> to vector<2x16xf32>
    %103 = vector.shape_cast %102 : vector<2x16xf32> to vector<2x16x1xf32>
    %104 = vector.broadcast %103 : vector<2x16x1xf32> to vector<2x16x16xf32>
    %105 = arith.subf %101, %104 : vector<2x16x16xf32>
    %106 = math.exp %105 : vector<2x16x16xf32>
    %cst_36 = arith.constant dense<0.000000e+00> : vector<2x16xf32>
    %107 = vector.multi_reduction <add>, %106, %cst_36 [2] : vector<2x16x16xf32> to vector<2x16xf32>
    %108 = vector.shape_cast %107 : vector<2x16xf32> to vector<2x16x1xf32>
    %109 = tpu.reciprocal %108 {approx = true} : vector<2x16x1xf32> -> vector<2x16x1xf32>
    %110 = vector.broadcast %109 : vector<2x16x1xf32> to vector<2x16x16xf32>
    %111 = arith.mulf %106, %110 : vector<2x16x16xf32>
    %112 = arith.truncf %111 : vector<2x16x16xf32> to vector<2x16x16xbf16>
    "tpu.trace_start"() <{level = 10 : i32, message = "bqk,bkd->bqd"}> : () -> ()
    %cst_37 = arith.constant dense<0.000000e+00> : vector<2x16x32xf32>
    %113 = tpu.matmul %112, %98, %cst_37 {dimension_numbers = #tpu.dot_dimension_numbers<[2], [1], [1], [2], [0, 0, 0, 1, 1, 2], [0], [0]>} : vector<2x16x16xbf16>, vector<2x16x32xbf16>, vector<2x16x32xf32> -> vector<2x16x32xf32>
    "tpu.trace_stop"() : () -> ()
    %114 = vector.shape_cast %113 : vector<2x16x32xf32> to vector<32x32xf32>
    %c0_38 = arith.constant 0 : index
    %c64 = arith.constant 64 : index
    %115 = vector.load %arg19[%c0_38, %c64] : memref<32x128xf32, #tpu.memory_space<vmem>>, vector<32x32xf32>
    tpu.vector_store %arg19[%c0_38, %c64], %114 {strides = array<i32>} : memref<32x128xf32, #tpu.memory_space<vmem>>, vector<32x32xf32>,
    %116 = vector.extract_strided_slice %41 {offsets = [0, 0, 96], sizes = [2, 16, 32], strides = [1, 1, 1]} : vector<2x16x128xf32> to vector<2x16x32xf32>
    %117 = arith.truncf %116 : vector<2x16x32xf32> to vector<2x16x32xbf16>
    %118 = vector.extract_strided_slice %43 {offsets = [0, 0, 96], sizes = [2, 16, 32], strides = [1, 1, 1]} : vector<2x16x128xf32> to vector<2x16x32xf32>
    %119 = arith.truncf %118 : vector<2x16x32xf32> to vector<2x16x32xbf16>
    %120 = vector.extract_strided_slice %45 {offsets = [0, 0, 96], sizes = [2, 16, 32], strides = [1, 1, 1]} : vector<2x16x128xf32> to vector<2x16x32xf32>
    %121 = arith.truncf %120 : vector<2x16x32xf32> to vector<2x16x32xbf16>
    "tpu.trace_start"() <{level = 10 : i32, message = "bqd,bkd->bqk"}> : () -> ()
    %cst_39 = arith.constant dense<0.000000e+00> : vector<2x16x16xf32>
    %122 = tpu.matmul %117, %119, %cst_39 {dimension_numbers = #tpu.dot_dimension_numbers<[2], [2], [1], [1], [0, 0, 0, 1, 1, 1], [0], [0]>} : vector<2x16x32xbf16>, vector<2x16x32xbf16>, vector<2x16x16xf32> -> vector<2x16x16xf32>
    "tpu.trace_stop"() : () -> ()
    %123 = vector.broadcast %46 : vector<1x16x16xf32> to vector<2x16x16xf32>
    %124 = arith.addf %122, %123 : vector<2x16x16xf32>
    %cst_40 = arith.constant dense<0xFF800000> : vector<2x16xf32>
    %125 = vector.multi_reduction <maximumf>, %124, %cst_40 [2] : vector<2x16x16xf32> to vector<2x16xf32>
    %126 = vector.shape_cast %125 : vector<2x16xf32> to vector<2x16x1xf32>
    %127 = vector.broadcast %126 : vector<2x16x1xf32> to vector<2x16x16xf32>
    %128 = arith.subf %124, %127 : vector<2x16x16xf32>
    %129 = math.exp %128 : vector<2x16x16xf32>
    %cst_41 = arith.constant dense<0.000000e+00> : vector<2x16xf32>
    %130 = vector.multi_reduction <add>, %129, %cst_41 [2] : vector<2x16x16xf32> to vector<2x16xf32>
    %131 = vector.shape_cast %130 : vector<2x16xf32> to vector<2x16x1xf32>
    %132 = tpu.reciprocal %131 {approx = true} : vector<2x16x1xf32> -> vector<2x16x1xf32>
    %133 = vector.broadcast %132 : vector<2x16x1xf32> to vector<2x16x16xf32>
    %134 = arith.mulf %129, %133 : vector<2x16x16xf32>
    %135 = arith.truncf %134 : vector<2x16x16xf32> to vector<2x16x16xbf16>
    "tpu.trace_start"() <{level = 10 : i32, message = "bqk,bkd->bqd"}> : () -> ()
    %cst_42 = arith.constant dense<0.000000e+00> : vector<2x16x32xf32>
    %136 = tpu.matmul %135, %121, %cst_42 {dimension_numbers = #tpu.dot_dimension_numbers<[2], [1], [1], [2], [0, 0, 0, 1, 1, 2], [0], [0]>} : vector<2x16x16xbf16>, vector<2x16x32xbf16>, vector<2x16x32xf32> -> vector<2x16x32xf32>
    "tpu.trace_stop"() : () -> ()
    %137 = vector.shape_cast %136 : vector<2x16x32xf32> to vector<32x32xf32>
    %c0_43 = arith.constant 0 : index
    %c96 = arith.constant 96 : index
    %138 = vector.load %arg19[%c0_43, %c96] : memref<32x128xf32, #tpu.memory_space<vmem>>, vector<32x32xf32>
    tpu.vector_store %arg19[%c0_43, %c96], %137 {strides = array<i32>} : memref<32x128xf32, #tpu.memory_space<vmem>>, vector<32x32xf32>,
    %c0_44 = arith.constant 0 : index
    %c0_45 = arith.constant 0 : index
    %139 = vector.load %arg19[%c0_44, %c0_45] : memref<32x128xf32, #tpu.memory_space<vmem>>, vector<32x128xf32>
    %140 = arith.truncf %139 : vector<32x128xf32> to vector<32x128xbf16>
    %c0_46 = arith.constant 0 : index
    %c0_47 = arith.constant 0 : index
    %c0_48 = arith.constant 0 : index
    %141 = vector.load %arg7[%c0_46, %c0_47, %c0_48] : memref<1x128x128xbf16, #tpu.memory_space<vmem>>, vector<1x128x128xbf16>
    %142 = vector.shape_cast %141 : vector<1x128x128xbf16> to vector<128x128xbf16>
    %cst_49 = arith.constant dense<0.000000e+00> : vector<32x128xf32>
    %143 = tpu.matmul %140, %142, %cst_49 {dimension_numbers = #tpu.dot_dimension_numbers<[1], [0], [0], [1], [0, 0, 1, 1], [], []>} : vector<32x128xbf16>, vector<128x128xbf16>, vector<32x128xf32> -> vector<32x128xf32>
    %c0_50 = arith.constant 0 : index
    %c0_51 = arith.constant 0 : index
    %c0_52 = arith.constant 0 : index
    %144 = vector.load %arg8[%c0_50, %c0_51, %c0_52] : memref<1x1x128xf32, #tpu.memory_space<vmem>>, vector<1x1x128xf32>
    %145 = vector.shape_cast %144 : vector<1x1x128xf32> to vector<1x128xf32>
    %146 = vector.broadcast %145 : vector<1x128xf32> to vector<32x128xf32>
    %147 = arith.addf %143, %146 : vector<32x128xf32>
    %148 = arith.addf %3, %147 : vector<32x128xf32>
    %c0_53 = arith.constant 0 : index
    %c0_54 = arith.constant 0 : index
    %c0_55 = arith.constant 0 : index
    %149 = vector.load %arg9[%c0_53, %c0_54, %c0_55] : memref<1x1x128xf32, #tpu.memory_space<vmem>>, vector<1x1x128xf32>
    %150 = vector.shape_cast %149 : vector<1x1x128xf32> to vector<1x128xf32>
    %c0_56 = arith.constant 0 : index
    %c0_57 = arith.constant 0 : index
    %c0_58 = arith.constant 0 : index
    %151 = vector.load %arg10[%c0_56, %c0_57, %c0_58] : memref<1x1x128xf32, #tpu.memory_space<vmem>>, vector<1x1x128xf32>
    %152 = vector.shape_cast %151 : vector<1x1x128xf32> to vector<1x128xf32>
    %cst_59 = arith.constant dense<0.000000e+00> : vector<32xf32>
    %153 = vector.multi_reduction <add>, %148, %cst_59 [1] : vector<32x128xf32> to vector<32xf32>
    %154 = vector.shape_cast %153 : vector<32xf32> to vector<32x1xf32>
    %cst_60 = arith.constant 1.280000e+02 : f32
    %155 = vector.broadcast %cst_60 : f32 to vector<32x1xf32>
    %156 = arith.divf %154, %155 : vector<32x1xf32>
    %157 = vector.broadcast %156 : vector<32x1xf32> to vector<32x128xf32>
    %158 = arith.subf %148, %157 : vector<32x128xf32>
    %159 = arith.mulf %158, %158 : vector<32x128xf32>
    %cst_61 = arith.constant dense<0.000000e+00> : vector<32xf32>
    %160 = vector.multi_reduction <add>, %159, %cst_61 [1] : vector<32x128xf32> to vector<32xf32>
    %161 = vector.shape_cast %160 : vector<32xf32> to vector<32x1xf32>
    %cst_62 = arith.constant 1.280000e+02 : f32
    %162 = vector.broadcast %cst_62 : f32 to vector<32x1xf32>
    %163 = arith.divf %161, %162 : vector<32x1xf32>
    %164 = vector.broadcast %156 : vector<32x1xf32> to vector<32x128xf32>
    %165 = arith.subf %148, %164 : vector<32x128xf32>
    %cst_63 = arith.constant 9.99999974E-6 : f32
    %166 = vector.broadcast %cst_63 : f32 to vector<32x1xf32>
    %167 = arith.addf %163, %166 : vector<32x1xf32>
    %168 = math.rsqrt %167 : vector<32x1xf32>
    %169 = vector.broadcast %168 : vector<32x1xf32> to vector<32x128xf32>
    %170 = arith.mulf %165, %169 : vector<32x128xf32>
    %171 = vector.broadcast %150 : vector<1x128xf32> to vector<32x128xf32>
    %172 = arith.mulf %170, %171 : vector<32x128xf32>
    %173 = vector.broadcast %152 : vector<1x128xf32> to vector<32x128xf32>
    %174 = arith.addf %172, %173 : vector<32x128xf32>
    %175 = arith.truncf %174 : vector<32x128xf32> to vector<32x128xbf16>
    %c0_64 = arith.constant 0 : index
    %c0_65 = arith.constant 0 : index
    %c0_66 = arith.constant 0 : index
    %176 = vector.load %arg11[%c0_64, %c0_65, %c0_66] : memref<1x128x512xbf16, #tpu.memory_space<vmem>>, vector<1x128x512xbf16>
    %177 = vector.shape_cast %176 : vector<1x128x512xbf16> to vector<128x512xbf16>
    %cst_67 = arith.constant dense<0.000000e+00> : vector<32x512xf32>
    %178 = tpu.matmul %175, %177, %cst_67 {dimension_numbers = #tpu.dot_dimension_numbers<[1], [0], [0], [1], [0, 0, 1, 1], [], []>} : vector<32x128xbf16>, vector<128x512xbf16>, vector<32x512xf32> -> vector<32x512xf32>
    %c0_68 = arith.constant 0 : index
    %c0_69 = arith.constant 0 : index
    %c0_70 = arith.constant 0 : index
    %179 = vector.load %arg12[%c0_68, %c0_69, %c0_70] : memref<1x1x512xf32, #tpu.memory_space<vmem>>, vector<1x1x512xf32>
    %180 = vector.shape_cast %179 : vector<1x1x512xf32> to vector<1x512xf32>
    %181 = vector.broadcast %180 : vector<1x512xf32> to vector<32x512xf32>
    %182 = arith.addf %178, %181 : vector<32x512xf32>
    %cst_71 = arith.constant 1.702000e+00 : f32
    %183 = vector.broadcast %cst_71 : f32 to vector<32x512xf32>
    %184 = arith.mulf %183, %182 : vector<32x512xf32>
    %185 = arith.negf %184 : vector<32x512xf32>
    %186 = math.exp %185 : vector<32x512xf32>
    %cst_72 = arith.constant 1.000000e+00 : f32
    %187 = vector.broadcast %cst_72 : f32 to vector<32x512xf32>
    %188 = arith.addf %187, %186 : vector<32x512xf32>
    %189 = arith.divf %187, %188 : vector<32x512xf32>
    %190 = arith.mulf %182, %189 : vector<32x512xf32>
    %191 = arith.truncf %190 : vector<32x512xf32> to vector<32x512xbf16>
    %c0_73 = arith.constant 0 : index
    %c0_74 = arith.constant 0 : index
    %c0_75 = arith.constant 0 : index
    %192 = vector.load %arg13[%c0_73, %c0_74, %c0_75] : memref<1x512x128xbf16, #tpu.memory_space<vmem>>, vector<1x512x128xbf16>
    %193 = vector.shape_cast %192 : vector<1x512x128xbf16> to vector<512x128xbf16>
    %cst_76 = arith.constant dense<0.000000e+00> : vector<32x128xf32>
    %194 = tpu.matmul %191, %193, %cst_76 {dimension_numbers = #tpu.dot_dimension_numbers<[1], [0], [0], [1], [0, 0, 1, 1], [], []>} : vector<32x512xbf16>, vector<512x128xbf16>, vector<32x128xf32> -> vector<32x128xf32>
    %c0_77 = arith.constant 0 : index
    %c0_78 = arith.constant 0 : index
    %c0_79 = arith.constant 0 : index
    %195 = vector.load %arg14[%c0_77, %c0_78, %c0_79] : memref<1x1x128xf32, #tpu.memory_space<vmem>>, vector<1x1x128xf32>
    %196 = vector.shape_cast %195 : vector<1x1x128xf32> to vector<1x128xf32>
    %197 = vector.broadcast %196 : vector<1x128xf32> to vector<32x128xf32>
    %198 = arith.addf %194, %197 : vector<32x128xf32>
    %199 = arith.addf %148, %198 : vector<32x128xf32>
    %c0_80 = arith.constant 0 : index
    %c0_81 = arith.constant 0 : index
    %200 = vector.load %arg18[%c0_80, %c0_81] : memref<32x128xf32, #tpu.memory_space<vmem>>, vector<32x128xf32>
    tpu.vector_store %arg18[%c0_80, %c0_81], %199 {strides = array<i32>} : memref<32x128xf32, #tpu.memory_space<vmem>>, vector<32x128xf32>,
    %c1_i32 = arith.constant 1 : i32
    %201 = arith.cmpi eq, %arg0, %c1_i32 : i32
    %202 = arith.extui %201 : i1 to i32
    %c0_i32_82 = arith.constant 0 : i32
    %203 = arith.cmpi ne, %202, %c0_i32_82 : i32
    scf.if %203 {
      %c0_83 = arith.constant 0 : index
      %c0_84 = arith.constant 0 : index
      %204 = vector.load %arg15[%c0_83, %c0_84] : memref<1x128xf32, #tpu.memory_space<vmem>>, vector<1x128xf32>
      %c0_85 = arith.constant 0 : index
      %c0_86 = arith.constant 0 : index
      %205 = vector.load %arg16[%c0_85, %c0_86] : memref<1x128xf32, #tpu.memory_space<vmem>>, vector<1x128xf32>
      %cst_87 = arith.constant dense<0.000000e+00> : vector<32xf32>
      %206 = vector.multi_reduction <add>, %199, %cst_87 [1] : vector<32x128xf32> to vector<32xf32>
      %207 = vector.shape_cast %206 : vector<32xf32> to vector<32x1xf32>
      %cst_88 = arith.constant 1.280000e+02 : f32
      %208 = vector.broadcast %cst_88 : f32 to vector<32x1xf32>
      %209 = arith.divf %207, %208 : vector<32x1xf32>
      %210 = vector.broadcast %209 : vector<32x1xf32> to vector<32x128xf32>
      %211 = arith.subf %199, %210 : vector<32x128xf32>
      %212 = arith.mulf %211, %211 : vector<32x128xf32>
      %cst_89 = arith.constant dense<0.000000e+00> : vector<32xf32>
      %213 = vector.multi_reduction <add>, %212, %cst_89 [1] : vector<32x128xf32> to vector<32xf32>
      %214 = vector.shape_cast %213 : vector<32xf32> to vector<32x1xf32>
      %cst_90 = arith.constant 1.280000e+02 : f32
      %215 = vector.broadcast %cst_90 : f32 to vector<32x1xf32>
      %216 = arith.divf %214, %215 : vector<32x1xf32>
      %217 = vector.broadcast %209 : vector<32x1xf32> to vector<32x128xf32>
      %218 = arith.subf %199, %217 : vector<32x128xf32>
      %cst_91 = arith.constant 9.99999974E-6 : f32
      %219 = vector.broadcast %cst_91 : f32 to vector<32x1xf32>
      %220 = arith.addf %216, %219 : vector<32x1xf32>
      %221 = math.rsqrt %220 : vector<32x1xf32>
      %222 = vector.broadcast %221 : vector<32x1xf32> to vector<32x128xf32>
      %223 = arith.mulf %218, %222 : vector<32x128xf32>
      %224 = vector.broadcast %204 : vector<1x128xf32> to vector<32x128xf32>
      %225 = arith.mulf %223, %224 : vector<32x128xf32>
      %226 = vector.broadcast %205 : vector<1x128xf32> to vector<32x128xf32>
      %227 = arith.addf %225, %226 : vector<32x128xf32>
      %228 = vector.shape_cast %227 : vector<32x128xf32> to vector<2x16x128xf32>
      %c0_92 = arith.constant 0 : index
      %c0_93 = arith.constant 0 : index
      %c0_94 = arith.constant 0 : index
      %229 = vector.load %arg17[%c0_92, %c0_93, %c0_94] : memref<2x16x128xf32, #tpu.memory_space<vmem>>, vector<2x16x128xf32>
      tpu.vector_store %arg17[%c0_92, %c0_93, %c0_94], %228 {strides = array<i32>} : memref<2x16x128xf32, #tpu.memory_space<vmem>>, vector<2x16x128xf32>,
    } else {
    }
    return
  }
  func.func @transform_0(%arg0: i32) -> (i32, i32, i32) {
    %c0_i32 = arith.constant 0 : i32
    %c0_i32_0 = arith.constant 0 : i32
    %c0_i32_1 = arith.constant 0 : i32
    %c0_i32_2 = arith.constant 0 : i32
    return %c0_i32, %c0_i32_0, %c0_i32_1 : i32, i32, i32
  }
  func.func @transform_1(%arg0: i32) -> (i32, i32, i32) {
    %c0_i32 = arith.constant 0 : i32
    %c0_i32_0 = arith.constant 0 : i32
    %c0_i32_1 = arith.constant 0 : i32
    %c0_i32_2 = arith.constant 0 : i32
    return %c0_i32, %c0_i32_0, %c0_i32_1 : i32, i32, i32
  }
  func.func @transform_2(%arg0: i32) -> (i32, i32, i32) {
    %c0_i32 = arith.constant 0 : i32
    %c0_i32_0 = arith.constant 0 : i32
    %c0_i32_1 = arith.constant 0 : i32
    return %arg0, %c0_i32, %c0_i32_0 : i32, i32, i32
  }
  func.func @transform_3(%arg0: i32) -> (i32, i32, i32) {
    %c0_i32 = arith.constant 0 : i32
    %c0_i32_0 = arith.constant 0 : i32
    %c0_i32_1 = arith.constant 0 : i32
    return %arg0, %c0_i32, %c0_i32_0 : i32, i32, i32
  }
  func.func @transform_4(%arg0: i32) -> (i32, i32, i32) {
    %c0_i32 = arith.constant 0 : i32
    %c0_i32_0 = arith.constant 0 : i32
    %c0_i32_1 = arith.constant 0 : i32
    return %arg0, %c0_i32, %c0_i32_0 : i32, i32, i32
  }
  func.func @transform_5(%arg0: i32) -> (i32, i32, i32) {
    %c0_i32 = arith.constant 0 : i32
    %c0_i32_0 = arith.constant 0 : i32
    %c0_i32_1 = arith.constant 0 : i32
    return %arg0, %c0_i32, %c0_i32_0 : i32, i32, i32
  }
  func.func @transform_6(%arg0: i32) -> (i32, i32, i32) {
    %c0_i32 = arith.constant 0 : i32
    %c0_i32_0 = arith.constant 0 : i32
    %c0_i32_1 = arith.constant 0 : i32
    return %arg0, %c0_i32, %c0_i32_0 : i32, i32, i32
  }
  func.func @transform_7(%arg0: i32) -> (i32, i32, i32) {
    %c0_i32 = arith.constant 0 : i32
    %c0_i32_0 = arith.constant 0 : i32
    %c0_i32_1 = arith.constant 0 : i32
    return %arg0, %c0_i32, %c0_i32_0 : i32, i32, i32
  }
  func.func @transform_8(%arg0: i32) -> (i32, i32, i32) {
    %c0_i32 = arith.constant 0 : i32
    %c0_i32_0 = arith.constant 0 : i32
    %c0_i32_1 = arith.constant 0 : i32
    return %arg0, %c0_i32, %c0_i32_0 : i32, i32, i32
  }
  func.func @transform_9(%arg0: i32) -> (i32, i32, i32) {
    %c0_i32 = arith.constant 0 : i32
    %c0_i32_0 = arith.constant 0 : i32
    %c0_i32_1 = arith.constant 0 : i32
    return %arg0, %c0_i32, %c0_i32_0 : i32, i32, i32
  }
  func.func @transform_10(%arg0: i32) -> (i32, i32, i32) {
    %c0_i32 = arith.constant 0 : i32
    %c0_i32_0 = arith.constant 0 : i32
    %c0_i32_1 = arith.constant 0 : i32
    return %arg0, %c0_i32, %c0_i32_0 : i32, i32, i32
  }
  func.func @transform_11(%arg0: i32) -> (i32, i32, i32) {
    %c0_i32 = arith.constant 0 : i32
    %c0_i32_0 = arith.constant 0 : i32
    %c0_i32_1 = arith.constant 0 : i32
    return %arg0, %c0_i32, %c0_i32_0 : i32, i32, i32
  }
  func.func @transform_12(%arg0: i32) -> (i32, i32, i32) {
    %c0_i32 = arith.constant 0 : i32
    %c0_i32_0 = arith.constant 0 : i32
    %c0_i32_1 = arith.constant 0 : i32
    return %arg0, %c0_i32, %c0_i32_0 : i32, i32, i32
  }
  func.func @transform_13(%arg0: i32) -> (i32, i32, i32) {
    %c0_i32 = arith.constant 0 : i32
    %c0_i32_0 = arith.constant 0 : i32
    %c0_i32_1 = arith.constant 0 : i32
    return %arg0, %c0_i32, %c0_i32_0 : i32, i32, i32
  }
  func.func @transform_14(%arg0: i32) -> (i32, i32) {
    %c0_i32 = arith.constant 0 : i32
    %c0_i32_0 = arith.constant 0 : i32
    %c0_i32_1 = arith.constant 0 : i32
    return %c0_i32, %c0_i32_0 : i32, i32
  }
  func.func @transform_15(%arg0: i32) -> (i32, i32) {
    %c0_i32 = arith.constant 0 : i32
    %c0_i32_0 = arith.constant 0 : i32
    %c0_i32_1 = arith.constant 0 : i32
    return %c0_i32, %c0_i32_0 : i32, i32
  }
  func.func @transform_16(%arg0: i32) -> (i32, i32, i32) {
    %c0_i32 = arith.constant 0 : i32
    %c0_i32_0 = arith.constant 0 : i32
    %c0_i32_1 = arith.constant 0 : i32
    %c0_i32_2 = arith.constant 0 : i32
    return %c0_i32, %c0_i32_0, %c0_i32_1 : i32, i32, i32
  }
}

</mosaic_0001>

<bundles_post_ra>
// kernel: frozen_clip_embedder_forward.1
= control target key start
LH: loop header
LB: loop body
LE: loop exit
PB: predicated region body
PF: predicated region fallthrough
CT: control target
= control target key end

     0   :  { %s5255_s0 = inlined_call_operand.vmem [shape: f32[2,16,128], index: 0, kind: input, shape index: {}]   ;;  %s5256_s1 = inlined_call_operand.vmem [shape: f32[1,16,16], index: 1, kind: input, shape index: {}]   ;;  %s5257_s2 = inlined_call_operand.vmem [shape: f32[2,1,128], index: 2, kind: input, shape index: {}]   ;;  %s5258_s3 = inlined_call_operand.vmem [shape: f32[2,1,128], index: 3, kind: input, shape index: {}]   ;;  %s5259_s4 = inlined_call_operand.vmem [shape: bf16[2,128,384], index: 4, kind: input, shape index: {}]   ;;  %s5260_s5 = inlined_call_operand.vmem [shape: f32[2,1,384], index: 5, kind: input, shape index: {}]   ;;  %s5261_s6 = inlined_call_operand.hbm [shape: bf16[2,128,128], index: 6, kind: input, shape index: {}]   ;;  %s5262_s7 = inlined_call_operand.vmem [shape: f32[2,1,128], index: 7, kind: input, shape index: {}]   ;;  %s5263_s8 = inlined_call_operand.vmem [shape: f32[2,1,128], index: 8, kind: input, shape index: {}]   ;;  %s5264_s9 = inlined_call_operand.vmem [shape: f32[2,1,128], index: 9, kind: input, shape index: {}]   ;;  %s5265_s10 = inlined_call_operand.hbm [shape: bf16[2,128,512], index: 10, kind: input, shape index: {}]   ;;  %s5266_s11 = inlined_call_operand.vmem [shape: f32[2,1,512], index: 11, kind: input, shape index: {}]   ;;  %s5267_s12 = inlined_call_operand.hbm [shape: bf16[2,512,128], index: 12, kind: input, shape index: {}]   ;;  %s5268_s13 = inlined_call_operand.vmem [shape: f32[2,1,128], index: 13, kind: input, shape index: {}]   ;;  %s5269_s14 = inlined_call_operand.vmem [shape: f32[1,128], index: 14, kind: input, shape index: {}]   ;;  %s5270_s15 = inlined_call_operand.vmem [shape: f32[1,128], index: 15, kind: input, shape index: {}]   ;;  %s5271_s16 = inlined_call_operand.hbm [shape: f32[2,16,128], index: 16, kind: output, shape index: {}]  }
   0x1   :  { %5281 = sst [smem:[#allocation17_spill]] %s5255_s0 }
   0x2   :  { %5282 = sst [smem:[#allocation18_spill]] %s5256_s1 }
   0x3   :  { %5283 = sst [smem:[#allocation19_spill]] %s5261_s6 }
   0x4   :  { %5284 = sst [smem:[#allocation20_spill]] %s5265_s10 }
   0x5   :  { %5285 = sst [smem:[#allocation21_spill]] %s5267_s12 }
   0x6   :  { %5286 = sst [smem:[#allocation22_spill]] %s5268_s13 }
   0x7   :  { %5287 = sst [smem:[#allocation23_spill]] %s5269_s14 }
   0x8   :  { %5288 = sst [smem:[#allocation24_spill]] %s5270_s15 }
   0x9   :  { %5289 = sst [smem:[#allocation25_spill]] %s5271_s16 }
   0xa   :  { %21 = vsyncpa [#allocation5], 0 }
   0xb   :  { %23 = vsyncpa [#allocation5 + $0x1], 0 }
   0xc   :  { %24 = vsyncpa [#allocation8], 0 }
   0xd   :  { %26 = vsyncpa [#allocation8 + $0x1], 0 }
   0xe   :  { %27 = vsyncpa [#allocation6], 0  ;;  %s4452_s21 = smov 0   ;;  %s4454_s22 = smov 0  }
   0xf   :  { %s4456_s23 = smov 0   ;;  %s4458_s24 = smov 0  }
  0x10 LB: > { %5290 = sst [smem:[#allocation14_spill]] %s4345_s23  ;;  %s4471_s25 = sadd.s32 4294967295, %s4349_s24   ;;  %s4349_s24 = sphi %s4458_s24, %s5317_s24   ;;  %s4345_s23 = sphi %s4456_s23, %s5319_s23   ;;  %s4341_s22 = sphi %s4454_s22, %s5321_s22   ;;  %s4337_s21 = sphi %s4452_s21, %s5320_s21  }
  0x11   : > { %s4474_s26 = sadd.s32 1, %s4349_s24   ;;  %s186_s28 = sadd.s32 1, %s4345_s23 }
  0x12   : > { %5291 = sst [smem:[#allocation15_spill]] %s4474_s26  ;;  %s183_s27 = ssub.s32 %s4349_s24, %s4474_s26 }
  0x13   : > { %p184_p0 = scmp.eq.s32.totalorder %s183_s27, 0  ;;  %p193_p1 = scmp.ne.s32.totalorder %s4345_s23, %s4341_s22 }
  0x14   : > { %p194_p2 = scmp.eq.s32.totalorder %s4349_s24, 0  ;;  %p199_p3 = scmp.ne.s32.totalorder %s4341_s22, %s4337_s21 }
  0x15   : > { %s4484_s29 = scalar_select %p184_p0, %s4345_s23, %s186_s28  }
  0x16   : > { %p195_p4 = por %p194_p2, %p193_p1  ;;  %p200_p5 = scmp.eq.s32.totalorder %s4471_s25, 0 }
  0x17   : > { %5292 = sst [smem:[#allocation16_spill]] %s4484_s29  ;;  %p3867_p6 = scmp.lt.s32.totalorder %s4349_s24, 2 }
  0x18   : > { %p4488_p7 = por %p200_p5, %p199_p3  ;;  %s4493_s0 = sand.u32 1, %s4345_s23  }
  0x19   : > { %p4495_p8 = pnand %p3867_p6, %p195_p4  ;;  %s546_s18 = sand.u32 1, %s4349_s24  }
  0x1a   : > { %s5293_s30 = scalar_select %p4488_p7, 1, 0 }
  0x1b   : > { %s5277_s19 = sshll.u32 %s4493_s0, 8  ;;  %s5278_s20 = sshll.u32 %s4349_s24, 12 }
  0x1c   : > { %s550_s21 = scalar_lea.vmem [#allocation7], %s5277_s19  ;;  %s5295_s10 = sld [smem:[#allocation20_spill]] }
  0x1d   : > { %s557_s27 = sshll.u32 %s550_s21, 4  ;;  %s4513_s23 = scalar_lea.sflag [#allocation8], %s546_s18  ;;  %s4511_s27 = int_to_ptr.vmem [resolvable:$true] %s557_s27 }
  0x1e   : > { %p4519_p10 = pneg %p4495_p8 }
  0x22   : > { %s4509_s26 = scalar_lea.hbm %s5295_s10, %s5278_s20  ;;  %s4196_s28 = scalar_lea.hbm %s5295_s10, 8192 }
  0x23   : > { %s4191_s16 = scalar_lea.hbm %s4509_s26, 4096  ;;  %p4197_p13 = scmp.lt.u32.totalorder %s4509_s26, %s5295_s10 }
  0x24   : > { %p4192_p9 = scmp.ne.s32.totalorder %s4509_s26, %s4191_s16  ;;  %p4198_p0 = scmp.lt.u32.totalorder %s4196_s28, %s4191_s16 }
  0x25   : > { %p4200_p2 = scmp.lt.u32.totalorder %s4191_s16, %s4509_s26 }
  0x26   : > { %p4194_p11 = pnand %p4519_p10, %p4192_p9  ;;  %p4199_p1 = por %p4198_p0, %p4197_p13 }
  0x28   : > { %p4195_p12 = pneg %p4194_p11  ;;  %p4201_p3 = por %p4200_p2, %p4199_p1 }
  0x2a   : > { %p4202_p4 = pnand %p4201_p3, %p4195_p12 }
  0x2c   : > { %4205 = shalt.err (!%p4202_p4)
}
  0x2d   : > { %s4206_s18 = scalar_lea.vmem %s4511_s27, 4096  ;;  %s4351_s29 = smov [#allocation7]  }
  0x2e   : > { %p4207_p5 = scmp.ne.s32.totalorder %s4511_s27, %s4206_s18  ;;  %s4211_s21 = sshll.u32 %s4351_s29, 4  ;;  %s4212_s21 = int_to_ptr.vmem [resolvable:$false] %s4211_s21 }
  0x2f   : > { %s4213_s15 = scalar_lea.vmem %s4212_s21, 8192  ;;  %p4214_p11 = scmp.lt.s32.totalorder %s4511_s27, %s4212_s21 }
  0x30   : > { %p4209_p6 = pnand %p4207_p5, %p4519_p10  ;;  %p4215_p7 = scmp.lt.s32.totalorder %s4213_s15, %s4206_s18 }
  0x32   : > { %p4210_p9 = pneg %p4209_p6  ;;  %p4216_p13 = por %p4215_p7, %p4214_p11 }
  0x34   : > { %p4217_p0 = pnand %p4216_p13, %p4210_p9 }
  0x36   : > { %4220 = shalt.err (!%p4217_p0)
}
  0x37   : > { %s4352_s16 = smov 256   ;;  %s4353_s20 = smov 16  }
  0x38   : > { %3863 = dma.hbm_to_vmem [thread:$0]  (!%p4495_p8), %s4509_s26, 4096, %s4511_s27, %s4513_s23, %s4352_s16, %s4352_s16, %s4353_s20  }
  0x39   : > { %s5297_s28 = sshll.u32 %s4349_s24, 12  ;;  %s5298_s12 = sld [smem:[#allocation21_spill]] }
  0x3a   : > { %s5299_s15 = sshll.u32 %s4493_s0, 8  ;;  %p3450_p7 = scmp.ge.s32.totalorder %s4349_s24, 1 }
  0x3b   : > { %s578_s10 = scalar_lea.vmem [#allocation9], %s5299_s15  ;;  %p599_p12 = scmp.lt.s32.totalorder %s4349_s24, 3 }
  0x3c   : > { %s585_s14 = sshll.u32 %s578_s10, 4  ;;  %s3441_s1 = sshll.u32 %s4493_s0, 6  ;;  %s4553_s14 = int_to_ptr.vmem [resolvable:$true] %s585_s14 }
  0x3d   : > { %p4557_p1 = pnand %p3450_p7, %p599_p12  ;;  %s3598_s26 = sshll.u32 %s4349_s24, 10 }
  0x3e   : > { %s511_s27 = scalar_lea.vmem [#allocation4], %s3441_s1  ;;  %s5301_s6 = sld [smem:[#allocation19_spill]] }
  0x3f   : > { %s4548_s21 = scalar_lea.hbm %s5298_s12, %s5297_s28  ;;  %s518_s16 = sshll.u32 %s511_s27, 4  ;;  %s4567_s16 = int_to_ptr.vmem [resolvable:$true] %s518_s16 }
  0x40   : > { %s5300_s13 = scalar_select %p4557_p1, 1, 0 }
  0x41   : > { %s508_s10 = scalar_lea.sflag [#allocation5], %s4493_s0 }
  0x44   : > { %s4565_s28 = scalar_lea.hbm %s5301_s6, %s3598_s26  ;;  %s4226_s15 = scalar_lea.hbm %s5301_s6, 2048 }
  0x45   : > { %s4221_s29 = scalar_lea.hbm %s4565_s28, 1024  ;;  %p4227_p5 = scmp.lt.u32.totalorder %s4565_s28, %s5301_s6 }
  0x46   : > { %p4222_p2 = scmp.ne.s32.totalorder %s4565_s28, %s4221_s29  ;;  %p4228_p6 = scmp.lt.u32.totalorder %s4226_s15, %s4221_s29 }
  0x47   : > { %p4230_p11 = scmp.lt.u32.totalorder %s4221_s29, %s4565_s28 }
  0x48   : > { %p4224_p3 = pnand %p4222_p2, %p4519_p10  ;;  %p4229_p9 = por %p4228_p6, %p4227_p5 }
  0x4a   : > { %p4225_p4 = pneg %p4224_p3  ;;  %p4231_p13 = por %p4230_p11, %p4229_p9 }
  0x4c   : > { %p4232_p0 = pnand %p4231_p13, %p4225_p4 }
  0x4e   : > { %4235 = shalt.err (!%p4232_p0)
}
  0x4f   : > { %s4236_s26 = scalar_lea.vmem %s4567_s16, 1024  ;;  %s4354_s18 = smov [#allocation4]  }
  0x50   : > { %p4237_p7 = scmp.ne.s32.totalorder %s4567_s16, %s4236_s26  ;;  %s4241_s24 = sshll.u32 %s4354_s18, 4  ;;  %s4242_s24 = int_to_ptr.vmem [resolvable:$false] %s4241_s24 }
  0x51   : > { %s4243_s1 = scalar_lea.vmem %s4242_s24, 2048  ;;  %p4244_p3 = scmp.lt.s32.totalorder %s4567_s16, %s4242_s24 }
  0x52   : > { %p4239_p12 = pnand %p4237_p7, %p4519_p10  ;;  %p4245_p1 = scmp.lt.s32.totalorder %s4243_s1, %s4236_s26 }
  0x54   : > { %p4240_p2 = pneg %p4239_p12  ;;  %p4246_p5 = por %p4245_p1, %p4244_p3 }
  0x56   : > { %p4247_p6 = pnand %p4246_p5, %p4240_p2 }
  0x58   : > { %4250 = shalt.err (!%p4247_p6)
}
  0x59   : > { %s4355_s29 = smov 64   ;;  %s4356_s15 = smov 4  }
  0x5a   : > { %3860 = dma.hbm_to_vmem [thread:$0]  (!%p4495_p8), %s4565_s28, 1024, %s4567_s16, %s508_s10, %s4355_s29, %s4355_s29, %s4356_s15  }
  0x5b   : > { %s4251_s27 = scalar_lea.hbm %s4548_s21, 4096  ;;  %s4256_s18 = scalar_lea.hbm %s5298_s12, 8192 }
  0x5c   : > { %p4252_p1 = scmp.ne.s32.totalorder %s4548_s21, %s4251_s27  ;;  %p4257_p11 = scmp.lt.u32.totalorder %s4548_s21, %s5298_s12 }
  0x5d   : > { %p4258_p13 = scmp.lt.u32.totalorder %s4256_s18, %s4251_s27  ;;  %p4260_p7 = scmp.lt.u32.totalorder %s4251_s27, %s4548_s21 }
  0x5e   : > { %p4254_p4 = pnand %p4252_p1, %p4519_p10 }
  0x5f   : > { %p4259_p0 = por %p4258_p13, %p4257_p11 }
  0x60   : > { %p4255_p9 = pneg %p4254_p4 }
  0x61   : > { %p4261_p12 = por %p4260_p7, %p4259_p0 }
  0x63   : > { %p4262_p2 = pnand %p4261_p12, %p4255_p9 }
  0x65   : > { %4265 = shalt.err (!%p4262_p2)
}
  0x66   : > { %s4266_s0 = scalar_lea.vmem %s4553_s14, 4096  ;;  %s4357_s16 = smov [#allocation9]  }
  0x67   : > { %p4267_p3 = scmp.ne.s32.totalorder %s4553_s14, %s4266_s0  ;;  %s4271_s28 = sshll.u32 %s4357_s16, 4  ;;  %s4272_s28 = int_to_ptr.vmem [resolvable:$false] %s4271_s28 }
  0x68   : > { %s4273_s10 = scalar_lea.vmem %s4272_s28, 8192  ;;  %p4274_p1 = scmp.lt.s32.totalorder %s4553_s14, %s4272_s28 }
  0x69   : > { %p4269_p5 = pnand %p4267_p3, %p4519_p10  ;;  %p4275_p4 = scmp.lt.s32.totalorder %s4273_s10, %s4266_s0 }
  0x6b   : > { %p4270_p6 = pneg %p4269_p5  ;;  %p4276_p11 = por %p4275_p4, %p4274_p1 }
  0x6d   : > { %p4277_p13 = pnand %p4276_p11, %p4270_p6 }
  0x6f   : > { %4280 = shalt.err (!%p4277_p13)
}
  0x70   : > { %3866 = dma.hbm_to_vmem [thread:$0]  (!%p4495_p8), %s4548_s21, 4096, %s4553_s14, %s4513_s23, %s4355_s29, %s4355_s29, %s4356_s15  }
  0x71   : > { %p5302_p10 = scmp.ne.s32.totalorder %s5300_s13, 0 }
  0x72   : > { %s605_s19 = sand.u32 (!%p5302_p10), 1, %s4341_s22   ;;  %p5303_p9 = scmp.ne.s32.totalorder (!%p5302_p10), %s5293_s30, 0 }
  0x73   : > { %603 = sbr.rel (%p5302_p10) target bundleno = 4662 (0x1236), region = 84  ;;  %s3451_s27 = sshll.u32 (!%p5302_p10), %s605_s19, 6 }
  0x74   : > { %s606_s20 = scalar_lea.sflag (!%p5302_p10), [#allocation5], %s605_s19  ;;  %s4624_s26 = scalar_lea.vmem (!%p5302_p10), [#allocation4], %s3451_s27 }
  0x7a   : > { %4324 = dma.done.wait (%p5303_p9), %s606_s20, 1024  }
  0x7b   : > { %4326 = vsyncadd (%p5303_p9), %s606_s20, 4294966272  ;;  %s614_s17 = sand.u32 1, %s4471_s25   ;;  %s3452_s18 = sshll.u32 %s605_s19, 8 }
  0x7c   : > { %s615_s14 = scalar_lea.sflag [#allocation8], %s614_s17  ;;  %s4631_s23 = scalar_lea.vmem [#allocation7], %s3452_s18 }
  0x7d   : > { %4328 = dma.done.wait (%p5303_p9), %s615_s14, 8192  }
  0x7e   : > { %4330 = vsyncadd (%p5303_p9), %s615_s14, 4294959104  ;;  %p712_p8 = scmp.lt.s32.totalorder %s4471_s25, 1  ;;  %s5304_s14 = sld [smem:[#allocation22_spill]] }
  0x7f   : > { %s4683_s21 = scalar_lea.vmem [#allocation9], %s3452_s18  ;;  %p3456_p0 = scmp.ne.s32.totalorder %s4471_s25, 0 }
  0x80   : > { %s4639_s13 = scalar_select %p712_p8, %s4471_s25, 1 }
  0x81   : > { %747 = sbr.rel (%p3456_p0) target bundleno = 138 (0x8a), region = 100  ;;  %s5305_s1 = sld [smem:[#allocation17_spill]] (!%p3456_p0) }
  0x82   : > { %s3845_s0 = smul.u32 192, %s4639_s13  ;;  %s735_s30 = scalar_lea.vmem %s5264_s9, %s4639_s13 }
  0x83   : > { %s3846_s19 = smul.u32 3, %s4639_s13  ;;  %s3455_s16 = sshll.u32 %s4639_s13, 2 }
  0x84   : > { %s4662_s29 = scalar_lea.vmem %s5259_s4, %s3845_s0  ;;  %s4677_s27 = scalar_lea.vmem %s5266_s11, %s3455_s16 }
  0x85   : > { %s4671_s12 = scalar_lea.vmem %s5260_s5, %s3846_s19  ;;  %s742_s0 = scalar_lea.vmem %s5304_s14, %s4639_s13 }
  0x87   : > { %v748_v0 = vld [vmem:[%s5305_s1] sm:$0xff] (!%p3456_p0)  ;;  %v749_v1 = vld [vmem:[%s5305_s1 + $0x8] sm:$0xff] (!%p3456_p0)  ;;  %v750_v2 = vld [vmem:[%s5305_s1 + $0x10] sm:$0xff] (!%p3456_p0) }
  0x88   : > { %752 = vst [vmem:[#allocation2] sm:$0xff] %v748_v0  ;;  %753 = vst [vmem:[#allocation2 + $0x8] sm:$0xff] %v749_v1  ;;  %v751_v3 = vld [vmem:[%s5305_s1 + $0x18] sm:$0xff] }
  0x89   : > { %754 = vst [vmem:[#allocation2 + $0x10] sm:$0xff] %v750_v2  ;;  %755 = vst [vmem:[#allocation2 + $0x18] sm:$0xff] %v751_v3 }
  0x8a PF: > { %v3915_v8 = vld [vmem:[%s4662_s29 + $0x4] ss:$12 sps:$4 sm:$0xff]   ;;  %v3917_v9 = vld [vmem:[%s4662_s29] ss:$12 sps:$4 sm:$0xff]   ;;  %v3918_v10 = vld [vmem:[%s4662_s29 + $0x1c] ss:$12 sps:$4 sm:$0xff]   ;;  %s5306_s20 = scalar_lea.vmem %s5257_s2, %s4639_s13  ;;  %s5307_s15 = scalar_lea.vmem %s5258_s3, %s4639_s13 }
  0x8b   : > { %v3920_v11 = vld [vmem:[%s4662_s29 + $0x8] ss:$12 sps:$4 sm:$0xff]   ;;  %1006 = vmatprep.subr.bf16.mxu0 %v3915_v8  ;;  %v3921_v28 = vld [vmem:[%s4662_s29 + $0x18] ss:$12 sps:$4 sm:$0xff]   ;;  %v3924_v30 = vld [vmem:[%s4662_s29 + $0x20] ss:$12 sps:$4 sm:$0xff]   ;;  %s5310_s14 = scalar_lea.vmem %s5262_s7, %s4639_s13 }
  0x8c   : > { %1007 = vmatpush1.bf16.msra.mxu0 %v3917_v9  ;;  %3709 = vmatprep.subr.bf16.mxu1 %v3920_v11  ;;  %v3922_v29 = vld [vmem:[%s4662_s29 + $0x34] ss:$12 sps:$4 sm:$0xff]   ;;  %v3925_v31 = vld [vmem:[%s4662_s29 + $0x30] ss:$12 sps:$4 sm:$0xff]   ;;  %v3926_v32 = vld [vmem:[%s4662_s29 + $0x4c] ss:$12 sps:$4 sm:$0xff]  }
  0x8d   : > { %1008 = vmatprep.subr.bf16.mxu0 %v3918_v10  ;;  %3710 = vmatpush3.bf16.msra.mxu1 %v3920_v11  ;;  %v3928_v33 = vld [vmem:[%s4662_s29 + $0x38] ss:$12 sps:$4 sm:$0xff]   ;;  %v3929_v34 = vld [vmem:[%s4662_s29 + $0x48] ss:$12 sps:$4 sm:$0xff]   ;;  %v3932_v36 = vld [vmem:[%s4662_s29 + $0x50] ss:$12 sps:$4 sm:$0xff]  }
  0x8e   : > { %3711 = vmatprep.subr.bf16.mxu1 %v3924_v30  ;;  %v3930_v35 = vld [vmem:[%s4662_s29 + $0x64] ss:$12 sps:$4 sm:$0xff]   ;;  %v3933_v37 = vld [vmem:[%s4662_s29 + $0x60] ss:$12 sps:$4 sm:$0xff]   ;;  %v3934_v38 = vld [vmem:[%s4662_s29 + $0x7c] ss:$12 sps:$4 sm:$0xff]  }
  0x8f   : > { %v3936_v39 = vld [vmem:[%s4662_s29 + $0x68] ss:$12 sps:$4 sm:$0xff]   ;;  %v3937_v40 = vld [vmem:[%s4662_s29 + $0x78] ss:$12 sps:$4 sm:$0xff]   ;;  %v3940_v42 = vld [vmem:[%s4662_s29 + $0x80] ss:$12 sps:$4 sm:$0xff]  }
  0x90   : > { %v758_v5 = vld [vmem:[#allocation2 + $0x10] sm:$0xff]  ;;  %v759_v7 = vld [vmem:[#allocation2 + $0x18] sm:$0xff]  ;;  %1009 = vmatpush1.bf16.msra.mxu0 %v3921_v28  ;;  %v4358_v43 = vmov 0   ;;  %v3457_v63 = vld [vmem:[%s5306_s20] ss:$0 sm:$0xff]  ;;  %vm4360_vm0 = vmmov 0  }
  0x91   : > { %v756_v4 = vld [vmem:[#allocation2] sm:$0xff]  ;;  %v757_v6 = vld [vmem:[#allocation2 + $0x8] sm:$0xff]  ;;  %766 = vadd.xlane.f32.xlu1 %v758_v5  ;;  %1010 = vmatprep.subr.bf16.mxu0 %v3922_v29  ;;  %v3941_v44 = vld [vmem:[%s4662_s29 + $0x90] ss:$12 sps:$4 sm:$0xff]   ;;  %vm1120_vm1 = vcmask 261120   ;;  %s5308_s24 = sld [smem:[#allocation18_spill]] }
  0x92   : > { %762 = vadd.xlane.f32.xlu0 %v756_v4  ;;  %3712 = vmatpush3.bf16.msra.mxu1 %v3924_v30  ;;  %v3938_v41 = vld [vmem:[%s4662_s29 + $0x94] ss:$12 sps:$4 sm:$0xff]   ;;  %v3942_v45 = vld [vmem:[%s4662_s29 + $0xac] ss:$12 sps:$4 sm:$0xff]   ;;  %v3946_v48 = vld [vmem:[%s4662_s29 + $0xb0] ss:$12 sps:$4 sm:$0xff]  }
  0x93   : > { %3713 = vmatprep.subr.bf16.mxu1 %v3928_v33  ;;  %1038 = vmatprep.mubr.bf16.mxu0 %v4358_v43  ;;  %v3944_v46 = vld [vmem:[%s4662_s29 + $0x98] ss:$12 sps:$4 sm:$0xff]   ;;  %v3945_v47 = vld [vmem:[%s4662_s29 + $0xa8] ss:$12 sps:$4 sm:$0xff]   ;;  %vm1215_vm2 = vcmask 130048   ;;  %s4361_s17 = smov 96  }
  0x94   : > { %1011 = vmatpush1.bf16.msra.mxu0 %v3925_v31  ;;  %s4362_s29 = smov 64   ;;  %s4363_s28 = smov 32   ;;  %vm1618_vm3 = vcmask 523520   ;;  %vm1881_vm4 = vcmask 785920   ;;  %vm2144_vm5 = vcmask 1048320  }
  0x95   : > { %768 = vadd.xlane.f32.xlu1 %v759_v7  ;;  %1012 = vmatprep.subr.bf16.mxu0 %v3926_v32  ;;  %p3591_p7 = scmp.ne.s32.totalorder %s4471_s25, 1 }
  0x96   : > { %764 = vadd.xlane.f32.xlu0 %v757_v6  ;;  %3714 = vmatpush3.bf16.msra.mxu1 %v3928_v33 }
  0x97   : > { %3715 = vmatprep.subr.bf16.mxu1 %v3932_v36  ;;  %s5309_s10 = smov %s5308_s24 }
  0x98   : > { %1013 = vmatpush1.bf16.msra.mxu0 %v3929_v34 }
  0x99   : > { %1014 = vmatprep.subr.bf16.mxu0 %v3930_v35 }
  0x9a   : > { %3716 = vmatpush3.bf16.msra.mxu1 %v3932_v36 }
  0x9b   : > { %3717 = vmatprep.subr.bf16.mxu1 %v3936_v39 }
  0x9c   : > { %1015 = vmatpush1.bf16.msra.mxu0 %v3933_v37 }
  0x9d   : > { %1016 = vmatprep.subr.bf16.mxu0 %v3934_v38 }
  0x9e   : > { %3718 = vmatpush3.bf16.msra.mxu1 %v3936_v39 }
  0x9f   : > { %3719 = vmatprep.subr.bf16.mxu1 %v3940_v42 }
  0xa0   : > { %1017 = vmatpush1.bf16.msra.mxu0 %v3937_v40 }
  0xa1   : > { %1018 = vmatprep.subr.bf16.mxu0 %v3938_v41 }
  0xa2   : > { %3720 = vmatpush3.bf16.msra.mxu1 %v3940_v42 }
  0xa3   : > { %3721 = vmatprep.subr.bf16.mxu1 %v3944_v46 }
  0xa4   : > { %1019 = vmatpush1.bf16.msra.mxu0 %v3941_v44 }
  0xa5   : > { %1020 = vmatprep.subr.bf16.mxu0 %v3942_v45 }
  0xa6   : > { %3722 = vmatpush3.bf16.msra.mxu1 %v3944_v46 }
  0xa7   : > { %3723 = vmatprep.subr.bf16.mxu1 %v3946_v48 }
  0xa8   : > { %1021 = vmatpush1.bf16.msra.mxu0 %v3945_v47 }
  0xaa   : > { %3724 = vmatpush3.bf16.msra.mxu1 %v3946_v48 }
 0x11e   : > { %v767_v13 = vpop.xlane.xlu1 %766 }
 0x11f   : > { %v763_v12 = vpop.xlane.xlu0 %762  ;;  %v773_v15 = vmul.f32 0.0078125, %v767_v13 }
 0x120   : > { %v771_v14 = vmul.f32 0.0078125, %v763_v12 }
 0x121   : > { %v4704_v17 = vsub.f32 %v758_v5, %v773_v15 }
 0x122   : > { %v4702_v16 = vsub.f32 %v756_v4, %v771_v14  ;;  %v769_v19 = vpop.xlane.xlu1 %768  ;;  %v3458_v4 = vld [vmem:[%s5307_s15] ss:$0 sm:$0xff]  ;;  %s5311_s15 = scalar_lea.vmem %s5263_s8, %s4639_s13 }
 0x123   : > { %v765_v18 = vpop.xlane.xlu0 %764  ;;  %v774_v22 = vmul.f32 0.0078125, %v769_v19  ;;  %v781_v25 = vmul.f32 %v4704_v17, %v4704_v17 }
 0x124   : > { %v772_v20 = vmul.f32 0.0078125, %v765_v18  ;;  %v779_v21 = vmul.f32 %v4702_v16, %v4702_v16  ;;  %v863_v18 = vlaneseq }
 0x125   : > { %v4710_v24 = vsub.f32 %v759_v7, %v774_v22 }
 0x126   : > { %v4708_v23 = vsub.f32 %v757_v6, %v772_v20  ;;  %783 = vadd.xlane.f32.xlu0 %v779_v21  ;;  %v4760_v19 = vshrl.u32 %v863_v18, 7  ;;  %v861_v21 = vld [vmem:[%s4671_s12] sm:$0x7] }
 0x127   : > { %v782_v27 = vmul.f32 %v4710_v24, %v4710_v24 }
 0x128   : > { %v780_v26 = vmul.f32 %v4708_v23, %v4708_v23  ;;  %v865_v20 = vsub.s32 0, %v4760_v19  ;;  %v869_v22 = vsub.s32 1, %v4760_v19 }
 0x12a   : > { %787 = vadd.xlane.f32.xlu0 %v781_v25  ;;  %785 = vadd.xlane.f32.xlu1 %v780_v26  ;;  %v870_v26 = vrot.slane %v861_v21, %v869_v22 }
 0x12e   : > { %789 = vadd.xlane.f32.xlu1 %v782_v27 }
 0x1b3   : > { %v784_v49 = vpop.xlane.xlu0 %783 }
 0x1b4   : > { %v791_v50 = vmul.f32 0.0078125, %v784_v49 }
 0x1b6   : > { %v795_v51 = vadd.f32 1e-05, %v791_v50 }
 0x1b7   : > { %v786_v52 = vpop.xlane.xlu1 %785  ;;  %v788_v53 = vpop.xlane.xlu0 %787 }
 0x1b8   : > { %4035 = vrsqrt.f32 %v795_v51  ;;  %v792_v54 = vmul.f32 0.0078125, %v786_v52  ;;  %v793_v55 = vmul.f32 0.0078125, %v788_v53 }
 0x1ba   : > { %v796_v56 = vadd.f32 1e-05, %v792_v54  ;;  %v797_v57 = vadd.f32 1e-05, %v793_v55 }
 0x1bb   : > { %v790_v58 = vpop.xlane.xlu1 %789 }
 0x1bc   : > { %4037 = vrsqrt.f32 %v796_v56  ;;  %v794_v59 = vmul.f32 0.0078125, %v790_v58 }
 0x1bd   : > { %4039 = vrsqrt.f32 %v797_v57 }
 0x1be   : > { %v798_v60 = vadd.f32 1e-05, %v794_v59 }
 0x1c0   : > { %4041 = vrsqrt.f32 %v798_v60 }
 0x1c2   : > { %v4036_v61 = vpop.eup %4035 }
 0x1c3   : > { %v803_v62 = vmul.f32 %v4036_v61, %v4702_v16 }
 0x1c5   : > { %v813_v3 = vmul.f32 %v3457_v63, %v803_v62 }
 0x1c6   : > { %v4038_v0 = vpop.eup %4037 }
 0x1c7   : > { %v4040_v1 = vpop.eup %4039  ;;  %v804_v2 = vmul.f32 %v4038_v0, %v4708_v23  ;;  %v823_v8 = vadd.f32 %v3458_v4, %v813_v3  ;;  %v866_v23 = vrot.slane %v861_v21, %v865_v20  ;;  %v4805_v0 = vld [vmem:[%s5308_s24] sm:$0xff]  ;;  %s5313_s24 = sld [smem:[#allocation23_spill]] (!%p3591_p7) }
 0x1c8   : > { %v805_v5 = vmul.f32 %v4040_v1, %v4704_v17  ;;  %v4359_v17 = vmov 0.0  }
 0x1c9   : > { %v814_v6 = vmul.f32 %v3457_v63, %v804_v2  ;;  %3729 = vmatprep.subr.bf16.mxu0 %v4359_v17  ;;  %3741 = vmatprep.subr.bf16.mxu1 %v4359_v17  ;;  %v4810_v2 = vld [vmem:[%s5309_s10 + $0x8] sm:$0xff] }
 0x1ca   : > { %v4042_v7 = vpop.eup %4041  ;;  %v815_v11 = vmul.f32 %v3457_v63, %v805_v5 }
 0x1cb   : > { %v824_v9 = vadd.f32 %v3458_v4, %v814_v6  ;;  %v806_v10 = vmul.f32 %v4042_v7, %v4710_v24  ;;  %v873_v24 = vsub.s32 2, %v4760_v19 }
 0x1cc   : > { %v825_v14 = vadd.f32 %v3458_v4, %v815_v11 }
 0x1cd   : > { %v827_v12 = vpack.c.bf16 %v824_v9, %v823_v8  ;;  %v816_v13 = vmul.f32 %v3457_v63, %v806_v10  ;;  %v874_v32 = vrot.slane %v861_v21, %v873_v24 }
 0x1cf   : > { %1039 = vmatmul.mubr.bf16.vlgmr.msra.gmra.mrb[0].mxu0 %v827_v12  ;;  %3725 = vmatprep.mubr.bf16.mxu1 %v827_v12  ;;  %v826_v15 = vadd.f32 %v3458_v4, %v816_v13 }
 0x1d0   : > { %1048 = vmatprep.mubr.bf16.mxu0 %v4358_v43 }
 0x1d1   : > { %v828_v16 = vpack.c.bf16 %v826_v15, %v825_v14 }
 0x1d3   : > { %3726 = vmatmul.mubr.bf16.vlgmr.msra.gmra.mrb[0].mxu1 %v828_v16 }
 0x1d4   : > { %3743 = vmatprep.mubr.msk.bf16.mxu1 %vm4360_vm0, %v4359_v17 }
 0x1d7   : > { %1049 = vmatmul.mubr.bf16.gmra.mrb[4].mxu0 %v828_v16 }
 0x1d8   : > { %3731 = vmatprep.mubr.msk.bf16.mxu0 %vm4360_vm0, %v4359_v17 }
 0x2a2   : > { %v1040_v25 = vpop.f32.mrb[0].mxu0 }
 0x2a3   : > { %v1041_v27 = vadd.f32 %v1040_v25, %v866_v23  ;;  %v1042_v28 = vpop.f32.mrb[1].mxu0 }
 0x2a4   : > { %v1044_v29 = vpop.f32.mrb[2].mxu0  ;;  %v1043_v33 = vadd.f32 %v1042_v28, %v870_v26 }
 0x2a5   : > { %v1045_v30 = vadd.f32 %v1044_v29, %v866_v23  ;;  %v1046_v31 = vpop.f32.mrb[3].mxu0  ;;  %v1108_v36 = vmul.f32 0.17677669, %v1041_v27 }
 0x2a6   : > { %v1047_v34 = vadd.f32 %v1046_v31, %v870_v26  ;;  %v3727_v35 = vpop.f32.mrb[0].mxu1 }
 0x2a7   : > { %v1109_v37 = vmul.f32 0.17677669, %v1045_v30  ;;  %v1093_v38 = vpop.f32.mrb[1].mxu1  ;;  %v1102_v42 = vadd.f32 %v3727_v35, %v874_v32 }
 0x2a8   : > { %v4772_v39 = vpack.c.bf16 %v1047_v34, %v1043_v33  ;;  %v3728_v40 = vpop.f32.mrb[2].mxu1  ;;  %v1094_v46 = vadd.f32 %v1093_v38, %v874_v32 }
 0x2a9   : > { %v4774_v41 = vpack.c.bf16 %v1109_v37, %v1108_v36  ;;  %v1105_v44 = vadd.f32 %v3728_v40, %v874_v32  ;;  %v1096_v45 = vpop.f32.mrb[3].mxu1 }
 0x2aa   : > { %v1097_v47 = vadd.f32 %v1096_v45, %v874_v32  ;;  %v1050_v48 = vpop.f32.mrb[4].mxu0  ;;  %v1125_v49 = vsel %vm1120_vm1, %v4772_v39, 0 }
 0x2ab   : > { %v4778_v50 = vpack.c.bf16 %v1105_v44, %v1102_v42  ;;  %v1051_v51 = vadd.f32 %v1050_v48, %v866_v23  ;;  %v1052_v52 = vpop.f32.mrb[5].mxu0  ;;  %3730 = vmatpush3.bf16.xpose.msra.mxu0 %v1125_v49 }
 0x2ac   : > { %v4780_v53 = vpack.c.bf16 %v1097_v47, %v1094_v46  ;;  %v1054_v54 = vpop.f32.mrb[6].mxu0  ;;  %3735 = vmatprep.subr.bf16.mxu0 %v4359_v17  ;;  %v1053_v57 = vadd.f32 %v1052_v52, %v870_v26 }
 0x2ad   : > { %v1055_v55 = vadd.f32 %v1054_v54, %v866_v23  ;;  %v1056_v56 = vpop.f32.mrb[7].mxu0  ;;  %v1110_v59 = vmul.f32 0.17677669, %v1051_v51 }
 0x2ae   : > { %v1057_v58 = vadd.f32 %v1056_v56, %v870_v26  ;;  %3742 = vmatpush3.bf16.msra.mxu1 %v4780_v53 }
 0x2af   : > { %v1111_v60 = vmul.f32 0.17677669, %v1055_v55  ;;  %3753 = vmatprep.subr.bf16.mxu1 %v4359_v17 }
 0x2b0   : > { %v4785_v61 = vpack.c.bf16 %v1057_v58, %v1053_v57 }
 0x2b1   : > { %v4787_v62 = vpack.c.bf16 %v1111_v60, %v1110_v59 }
 0x2b2   : > { %3732 = vmatmul.mubr.msk.bf16.vlgmr.msra.gmra.mrb[8].mxu0 %vm1120_vm1, %v4774_v41  ;;  %v1172_v63 = vsel %vm1120_vm1, %v4785_v61, 0 }
 0x2b3   : > { %3736 = vmatpush3.bf16.xpose.msra.mxu0 %v1172_v63  ;;  %3737 = vmatprep.mubr.msk.bf16.mxu0 %vm4360_vm0, %v4359_v17 }
 0x2b4   : > { %3747 = vmatprep.subr.bf16.mxu0 %v4359_v17 }
 0x2ba   : > { %3738 = vmatmul.mubr.msk.bf16.vlgmr.msra.gmra.mrb[12].mxu0 %vm1120_vm1, %v4787_v62 }
 0x2bb   : > { %3748 = vmatpush3.bf16.msra.mxu0 %v4778_v50  ;;  %3749 = vmatprep.mubr.msk.bf16.mxu0 %vm4360_vm0, %v4359_v17 }
 0x2bc   : > { %3759 = vmatprep.subr.bf16.mxu0 %v4359_v17 }
 0x385   : > { %v1161_v1 = vpop.f32.mrb[8].mxu0 }
 0x386   : > { %v1162_v3 = vadd.f32 %v1161_v1, %v4805_v0  ;;  %v3733_v4 = vpop.f32.mrb[9].mxu0 }
 0x387   : > { %v1164_v5 = vpop.f32.mrb[10].mxu0 }
 0x388   : > { %v1165_v6 = vadd.f32 %v1164_v5, %v4810_v2  ;;  %v3734_v7 = vpop.f32.mrb[11].mxu0  ;;  %v1216_v8 = vsel %vm1215_vm2, %v1162_v3, -inf }
 0x389   : > { %1217 = vmax.xlane.f32.xlu0 %v1216_v8 }
 0x38a   : > { %v1219_v9 = vsel %vm1215_vm2, %v1165_v6, -inf }
 0x38b   : > { %1220 = vmax.xlane.f32.xlu1 %v1219_v9 }
 0x38d   : > { %v1208_v10 = vpop.f32.mrb[12].mxu0 }
 0x38e   : > { %v1209_v11 = vadd.f32 %v1208_v10, %v4805_v0  ;;  %v3739_v12 = vpop.f32.mrb[13].mxu0 }
 0x38f   : > { %v1211_v13 = vpop.f32.mrb[14].mxu0 }
 0x390   : > { %v1212_v14 = vadd.f32 %v1211_v13, %v4810_v2  ;;  %v3740_v15 = vpop.f32.mrb[15].mxu0  ;;  %v1222_v16 = vsel %vm1215_vm2, %v1209_v11, -inf }
 0x391   : > { %1223 = vmax.xlane.f32.xlu0 %v1222_v16 }
 0x392   : > { %v1225_v18 = vsel %vm1215_vm2, %v1212_v14, -inf }
 0x393   : > { %1226 = vmax.xlane.f32.xlu1 %v1225_v18 }
 0x416   : > { %v1218_v21 = vpop.xlane.xlu0 %1217 }
 0x417   : > { %v1228_v23 = vsub.f32 %v1162_v3, %v1218_v21 }
 0x418   : > { %v1221_v25 = vpop.xlane.xlu1 %1220 }
 0x419   : > { %v1232_v26 = vmul.f32 1.442695, %v1228_v23  ;;  %v1229_v27 = vsub.f32 %v1165_v6, %v1221_v25 }
 0x41b   : > { %4043 = vpow2.f32 %v1232_v26  ;;  %v1234_v28 = vmul.f32 1.442695, %v1229_v27 }
 0x41d   : > { %4045 = vpow2.f32 %v1234_v28 }
 0x41e   : > { %v1224_v29 = vpop.xlane.xlu0 %1223 }
 0x41f   : > { %v1230_v30 = vsub.f32 %v1209_v11, %v1224_v29 }
 0x420   : > { %v1227_v38 = vpop.xlane.xlu1 %1226 }
 0x421   : > { %v1236_v31 = vmul.f32 1.442695, %v1230_v30  ;;  %v1231_v40 = vsub.f32 %v1212_v14, %v1227_v38 }
 0x423   : > { %4047 = vpow2.f32 %v1236_v31  ;;  %v1238_v42 = vmul.f32 1.442695, %v1231_v40 }
 0x425   : > { %v4044_v32 = vpop.eup %4043  ;;  %4049 = vpow2.f32 %v1238_v42 }
 0x426   : > { %v1240_v33 = vsel %vm1215_vm2, %v4044_v32, 0.0 }
 0x427   : > { %v4046_v34 = vpop.eup %4045  ;;  %1241 = vadd.xlane.f32.xlu0 %v1240_v33 }
 0x428   : > { %v1243_v35 = vsel %vm1215_vm2, %v4046_v34, 0.0 }
 0x429   : > { %1244 = vadd.xlane.f32.xlu1 %v1243_v35 }
 0x42d   : > { %v4048_v36 = vpop.eup %4047 }
 0x42e   : > { %v1246_v37 = vsel %vm1215_vm2, %v4048_v36, 0.0 }
 0x42f   : > { %1247 = vadd.xlane.f32.xlu0 %v1246_v37  ;;  %v4050_v44 = vpop.eup %4049 }
 0x430   : > { %v1249_v45 = vsel %vm1215_vm2, %v4050_v44, 0.0 }
 0x43a   : > { %1411 = vrot.lane.b32.xlu1 %v4785_v61, %s4361_s17 }
 0x445   : > { %1358 = vrot.lane.b32.xlu0 %v4772_v39, %s4361_s17 }
 0x45e   : > { %1250 = vadd.xlane.f32.xlu1 %v1249_v45 }
 0x46f   : > { %1355 = vrot.lane.b32.xlu1 %v4774_v41, %s4361_s17 }
 0x473   : > { %1408 = vrot.lane.b32.xlu1 %v4787_v62, %s4361_s17 }
 0x4b4   : > { %v1242_v46 = vpop.xlane.xlu0 %1241 }
 0x4b5   : > { %4051 = vrcp.f32 %v1242_v46 }
 0x4b6   : > { %v1245_v47 = vpop.xlane.xlu1 %1244 }
 0x4b7   : > { %4053 = vrcp.f32 %v1245_v47 }
 0x4ba   : > { %v1412_v58 = vpop.permute.xlu1 %1411 }
 0x4bb   : > { %v1417_v6 = vsel %vm1120_vm1, %v1412_v58, 0 }
 0x4bc   : > { %v1248_v48 = vpop.xlane.xlu0 %1247 }
 0x4bd   : > { %4055 = vrcp.f32 %v1248_v48 }
 0x4bf   : > { %v4052_v49 = vpop.eup %4051 }
 0x4c0   : > { %v1256_v52 = vmul.f32 %v4052_v49, %v4044_v32  ;;  %v1359_v55 = vpop.permute.xlu0 %1358 }
 0x4c1   : > { %v4054_v51 = vpop.eup %4053  ;;  %v1364_v57 = vsel %vm1120_vm1, %v1359_v55, 0 }
 0x4c2   : > { %v1257_v54 = vmul.f32 %v4054_v51, %v4046_v34 }
 0x4c4   : > { %v1260_v56 = vpack.c.bf16 %v1257_v54, %v1256_v52 }
 0x4c6   : > { %3744 = vmatmul.mubr.msk.bf16.vlgmr.msra.gmra.mrb[4].mxu1 %vm1215_vm2, %v1260_v56 }
 0x4c7   : > { %3754 = vmatpush3.bf16.xpose.msra.mxu1 %v1364_v57  ;;  %3755 = vmatprep.mubr.msk.bf16.mxu1 %vm4360_vm0, %v4359_v17  ;;  %v4056_v63 = vpop.eup %4055 }
 0x4c8   : > { %3765 = vmatprep.subr.bf16.mxu1 %v4359_v17  ;;  %v1258_v3 = vmul.f32 %v4056_v63, %v4048_v36 }
 0x4eb   : > { %v1251_v59 = vpop.xlane.xlu1 %1250 }
 0x4ec   : > { %4057 = vrcp.f32 %v1251_v59 }
 0x4ef   : > { %v1356_v60 = vpop.permute.xlu1 %1355 }
 0x4f0   : > { %3756 = vmatmul.mubr.msk.bf16.vlgmr.msra.gmra.mrb[8].mxu1 %vm1120_vm1, %v1356_v60 }
 0x4f1   : > { %3767 = vmatprep.mubr.msk.bf16.mxu1 %vm4360_vm0, %v4359_v17 }
 0x4f3   : > { %v1409_v7 = vpop.permute.xlu1 %1408 }
 0x4f6   : > { %v4058_v1 = vpop.eup %4057 }
 0x4f7   : > { %v1259_v4 = vmul.f32 %v4058_v1, %v4050_v44 }
 0x4f9   : > { %v1261_v5 = vpack.c.bf16 %v1259_v4, %v1258_v3 }
 0x4fb   : > { %3750 = vmatmul.mubr.msk.bf16.vlgmr.msra.gmra.mrb[16].mxu0 %vm1215_vm2, %v1261_v5 }
 0x4fc   : > { %3760 = vmatpush3.bf16.xpose.msra.mxu0 %v1417_v6  ;;  %3761 = vmatprep.mubr.msk.bf16.mxu0 %vm4360_vm0, %v4359_v17 }
 0x4fd   : > { %3771 = vmatprep.subr.bf16.mxu0 %v4359_v17 }
 0x503   : > { %3762 = vmatmul.mubr.msk.bf16.vlgmr.msra.gmra.mrb[20].mxu0 %vm1120_vm1, %v1409_v7 }
 0x504   : > { %3773 = vmatprep.mubr.msk.bf16.mxu0 %vm4360_vm0, %v4359_v17 }
 0x599   : > { %v1299_v8 = vpop.f32.mrb[4].mxu1 }
 0x59a   : > { %1350 = vst.msk [vmem:[#allocation3] sm:$0xff] %vm1120_vm1, %v1299_v8  ;;  %v3745_v9 = vpop.f32.mrb[5].mxu1 }
 0x59b   : > { %v1302_v10 = vpop.f32.mrb[6].mxu1 }
 0x59c   : > { %1351 = vst.msk [vmem:[#allocation3 + $0x8] sm:$0xff] %vm1120_vm1, %v1302_v10  ;;  %v3746_v11 = vpop.f32.mrb[7].mxu1 }
 0x5c3   : > { %v1400_v12 = vpop.f32.mrb[8].mxu1 }
 0x5c4   : > { %v1401_v13 = vadd.f32 %v1400_v12, %v4805_v0  ;;  %v3757_v14 = vpop.f32.mrb[9].mxu1 }
 0x5c5   : > { %v1403_v15 = vpop.f32.mrb[10].mxu1 }
 0x5c6   : > { %v1404_v16 = vadd.f32 %v1403_v15, %v4810_v2  ;;  %v3758_v18 = vpop.f32.mrb[11].mxu1  ;;  %v1460_v21 = vsel %vm1215_vm2, %v1401_v13, -inf }
 0x5c7   : > { %1461 = vmax.xlane.f32.xlu0 %v1460_v21 }
 0x5c8   : > { %v1463_v23 = vsel %vm1215_vm2, %v1404_v16, -inf }
 0x5c9   : > { %1464 = vmax.xlane.f32.xlu1 %v1463_v23 }
 0x5ce   : > { %v1343_v25 = vpop.f32.mrb[16].mxu0 }
 0x5cf   : > { %1352 = vst.msk [vmem:[#allocation3 + $0x10] sm:$0xff] %vm1120_vm1, %v1343_v25  ;;  %v3751_v26 = vpop.f32.mrb[17].mxu0 }
 0x5d0   : > { %v1346_v27 = vpop.f32.mrb[18].mxu0 }
 0x5d1   : > { %1353 = vst.msk [vmem:[#allocation3 + $0x18] sm:$0xff] %vm1120_vm1, %v1346_v27  ;;  %v3752_v28 = vpop.f32.mrb[19].mxu0 }
 0x5d6   : > { %v1453_v29 = vpop.f32.mrb[20].mxu0 }
 0x5d7   : > { %v1454_v30 = vadd.f32 %v1453_v29, %v4805_v0  ;;  %v3763_v31 = vpop.f32.mrb[21].mxu0 }
 0x5d8   : > { %v1456_v32 = vpop.f32.mrb[22].mxu0 }
 0x5d9   : > { %v1457_v33 = vadd.f32 %v1456_v32, %v4810_v2  ;;  %v3764_v34 = vpop.f32.mrb[23].mxu0  ;;  %v1466_v35 = vsel %vm1215_vm2, %v1454_v30, -inf }
 0x5da   : > { %1467 = vmax.xlane.f32.xlu0 %v1466_v35 }
 0x5db   : > { %v1469_v36 = vsel %vm1215_vm2, %v1457_v33, -inf }
 0x5de   : > { %1470 = vmax.xlane.f32.xlu0 %v1469_v36 }
 0x654   : > { %v1462_v37 = vpop.xlane.xlu0 %1461 }
 0x655   : > { %v1472_v38 = vsub.f32 %v1401_v13, %v1462_v37 }
 0x656   : > { %v1465_v40 = vpop.xlane.xlu1 %1464 }
 0x657   : > { %v1476_v42 = vmul.f32 1.442695, %v1472_v38  ;;  %v1473_v44 = vsub.f32 %v1404_v16, %v1465_v40 }
 0x659   : > { %4059 = vpow2.f32 %v1476_v42  ;;  %v1478_v45 = vmul.f32 1.442695, %v1473_v44 }
 0x65b   : > { %4061 = vpow2.f32 %v1478_v45 }
 0x663   : > { %v4060_v46 = vpop.eup %4059 }
 0x664   : > { %v1484_v47 = vsel %vm1215_vm2, %v4060_v46, 0.0 }
 0x665   : > { %v4062_v48 = vpop.eup %4061  ;;  %1485 = vadd.xlane.f32.xlu0 %v1484_v47 }
 0x666   : > { %v1487_v49 = vsel %vm1215_vm2, %v4062_v48, 0.0 }
 0x667   : > { %1488 = vadd.xlane.f32.xlu1 %v1487_v49  ;;  %v1468_v51 = vpop.xlane.xlu0 %1467 }
 0x668   : > { %v1474_v52 = vsub.f32 %v1454_v30, %v1468_v51 }
 0x66a   : > { %v1480_v54 = vmul.f32 1.442695, %v1474_v52 }
 0x66b   : > { %v1471_v57 = vpop.xlane.xlu0 %1470 }
 0x66c   : > { %4063 = vpow2.f32 %v1480_v54  ;;  %v1475_v58 = vsub.f32 %v1457_v33, %v1471_v57 }
 0x66e   : > { %v1482_v59 = vmul.f32 1.442695, %v1475_v58 }
 0x670   : > { %4065 = vpow2.f32 %v1482_v59 }
 0x676   : > { %v4064_v55 = vpop.eup %4063 }
 0x677   : > { %v1490_v56 = vsel %vm1215_vm2, %v4064_v55, 0.0 }
 0x678   : > { %1555 = vrot.lane.b32.xlu1 %v4778_v50, %s4361_s17  ;;  %1491 = vadd.xlane.f32.xlu0 %v1490_v56 }
 0x67a   : > { %v4066_v60 = vpop.eup %4065 }
 0x67b   : > { %v1493_v63 = vsel %vm1215_vm2, %v4066_v60, 0.0 }
 0x67c   : > { %1625 = vrot.lane.b32.xlu1 %v4772_v39, %s4362_s29 }
 0x68e   : > { %1507 = vrot.lane.b32.xlu0 %v4780_v53, %s4361_s17 }
 0x692   : > { %1623 = vrot.lane.b32.xlu0 %v4774_v41, %s4362_s29 }
 0x6a0   : > { %1494 = vadd.xlane.f32.xlu1 %v1493_v63 }
 0x6b1   : > { %1676 = vrot.lane.b32.xlu1 %v4785_v61, %s4362_s29 }
 0x6b5   : > { %1674 = vrot.lane.b32.xlu1 %v4787_v62, %s4362_s29 }
 0x6f2   : > { %v1486_v4 = vpop.xlane.xlu0 %1485 }
 0x6f4   : > { %v1489_v1 = vpop.xlane.xlu1 %1488 }
 0x6f5   : > { %4067 = vrcp.f32 %v1489_v1 }
 0x6f6   : > { %4069 = vrcp.f32 %v1486_v4 }
 0x6f8   : > { %v1556_v3 = vpop.permute.xlu1 %1555 }
 0x6f9   : > { %3772 = vmatpush3.bf16.msra.mxu0 %v1556_v3 }
 0x6fa   : > { %3783 = vmatprep.subr.bf16.mxu0 %v4359_v17 }
 0x6fc   : > { %v1626_v12 = vpop.permute.xlu1 %1625 }
 0x6fd   : > { %v1631_v13 = vsel %vm1120_vm1, %v1626_v12, 0 }
 0x6ff   : > { %v4068_v5 = vpop.eup %4067 }
 0x700   : > { %v4070_v7 = vpop.eup %4069  ;;  %v1501_v8 = vmul.f32 %v4068_v5, %v4062_v48 }
 0x701   : > { %v1500_v9 = vmul.f32 %v4070_v7, %v4060_v46 }
 0x703   : > { %v1504_v11 = vpack.c.bf16 %v1501_v8, %v1500_v9 }
 0x705   : > { %v1492_v6 = vpop.xlane.xlu0 %1491 }
 0x706   : > { %4071 = vrcp.f32 %v1492_v6 }
 0x709   : > { %v1508_v10 = vpop.permute.xlu0 %1507 }
 0x70a   : > { %3766 = vmatpush3.bf16.msra.mxu1 %v1508_v10 }
 0x70b   : > { %3777 = vmatprep.subr.bf16.mxu1 %v4359_v17 }
 0x70d   : > { %3768 = vmatmul.mubr.msk.bf16.vlgmr.msra.gmra.mrb[12].mxu1 %vm1215_vm2, %v1504_v11  ;;  %v1624_v14 = vpop.permute.xlu0 %1623 }
 0x70e   : > { %3779 = vmatprep.mubr.msk.bf16.mxu1 %vm4360_vm0, %v4359_v17 }
 0x710   : > { %v4072_v16 = vpop.eup %4071 }
 0x711   : > { %v1502_v21 = vmul.f32 %v4072_v16, %v4064_v55 }
 0x713   : > { %3778 = vmatpush3.bf16.xpose.msra.mxu1 %v1631_v13 }
 0x714   : > { %3789 = vmatprep.subr.bf16.mxu1 %v4359_v17 }
 0x71a   : > { %3780 = vmatmul.mubr.msk.bf16.vlgmr.msra.gmra.mrb[16].mxu1 %vm1120_vm1, %v1624_v14 }
 0x71b   : > { %3791 = vmatprep.mubr.msk.bf16.mxu1 %vm4360_vm0, %v4359_v17 }
 0x72d   : > { %v1495_v15 = vpop.xlane.xlu1 %1494 }
 0x72e   : > { %4073 = vrcp.f32 %v1495_v15 }
 0x731   : > { %v1677_v25 = vpop.permute.xlu1 %1676 }
 0x732   : > { %v1682_v27 = vsel %vm1120_vm1, %v1677_v25, 0 }
 0x735   : > { %v1675_v28 = vpop.permute.xlu1 %1674 }
 0x738   : > { %v4074_v18 = vpop.eup %4073 }
 0x739   : > { %v1503_v23 = vmul.f32 %v4074_v18, %v4066_v60 }
 0x73b   : > { %v1505_v26 = vpack.c.bf16 %v1503_v23, %v1502_v21 }
 0x73d   : > { %3774 = vmatmul.mubr.msk.bf16.vlgmr.msra.gmra.mrb[24].mxu0 %vm1215_vm2, %v1505_v26 }
 0x73e   : > { %3784 = vmatpush3.bf16.xpose.msra.mxu0 %v1682_v27  ;;  %3785 = vmatprep.mubr.msk.bf16.mxu0 %vm4360_vm0, %v4359_v17 }
 0x73f   : > { %3795 = vmatprep.subr.bf16.mxu0 %v4359_v17 }
 0x745   : > { %3786 = vmatmul.mubr.msk.bf16.vlgmr.msra.gmra.mrb[28].mxu0 %vm1120_vm1, %v1675_v28 }
 0x746   : > { %3797 = vmatprep.mubr.msk.bf16.mxu0 %vm4360_vm0, %v4359_v17 }
 0x7e0   : > { %v4894_v29 = vpop.f32.mrb[12].mxu1 }
 0x7e1   : > { %v3769_v30 = vpop.f32.mrb[13].mxu1 }
 0x7e2   : > { %v4896_v31 = vpop.f32.mrb[14].mxu1 }
 0x7e3   : > { %v3770_v32 = vpop.f32.mrb[15].mxu1 }
 0x7ed   : > { %v1667_v33 = vpop.f32.mrb[16].mxu1 }
 0x7ee   : > { %v1668_v34 = vadd.f32 %v1667_v33, %v4805_v0  ;;  %v3781_v35 = vpop.f32.mrb[17].mxu1 }
 0x7ef   : > { %v1670_v36 = vpop.f32.mrb[18].mxu1 }
 0x7f0   : > { %v1671_v37 = vadd.f32 %v1670_v36, %v4810_v2  ;;  %v3782_v38 = vpop.f32.mrb[19].mxu1  ;;  %v1725_v40 = vsel %vm1215_vm2, %v1668_v34, -inf }
 0x7f1   : > { %1726 = vmax.xlane.f32.xlu0 %v1725_v40 }
 0x7f2   : > { %v1728_v42 = vsel %vm1215_vm2, %v1671_v37, -inf }
 0x7f3   : > { %1729 = vmax.xlane.f32.xlu1 %v1728_v42 }
 0x810   : > { %v4902_v44 = vpop.f32.mrb[24].mxu0 }
 0x811   : > { %v3775_v45 = vpop.f32.mrb[25].mxu0 }
 0x812   : > { %v4904_v46 = vpop.f32.mrb[26].mxu0 }
 0x813   : > { %v3776_v47 = vpop.f32.mrb[27].mxu0 }
 0x818   : > { %v1718_v48 = vpop.f32.mrb[28].mxu0 }
 0x819   : > { %v1719_v49 = vadd.f32 %v1718_v48, %v4805_v0  ;;  %v3787_v51 = vpop.f32.mrb[29].mxu0 }
 0x81a   : > { %v1721_v52 = vpop.f32.mrb[30].mxu0 }
 0x81b   : > { %v1722_v54 = vadd.f32 %v1721_v52, %v4810_v2  ;;  %v3788_v55 = vpop.f32.mrb[31].mxu0  ;;  %v1731_v56 = vsel %vm1215_vm2, %v1719_v49, -inf }
 0x81c   : > { %1732 = vmax.xlane.f32.xlu0 %v1731_v56 }
 0x81d   : > { %v1734_v57 = vsel %vm1215_vm2, %v1722_v54, -inf }
 0x820   : > { %1735 = vmax.xlane.f32.xlu0 %v1734_v57 }
 0x87e   : > { %v1727_v58 = vpop.xlane.xlu0 %1726 }
 0x87f   : > { %v1737_v59 = vsub.f32 %v1668_v34, %v1727_v58 }
 0x880   : > { %v1730_v60 = vpop.xlane.xlu1 %1729 }
 0x881   : > { %v1741_v63 = vmul.f32 1.442695, %v1737_v59  ;;  %v1738_v1 = vsub.f32 %v1671_v37, %v1730_v60 }
 0x883   : > { %4075 = vpow2.f32 %v1741_v63  ;;  %v1743_v3 = vmul.f32 1.442695, %v1738_v1 }
 0x885   : > { %4077 = vpow2.f32 %v1743_v3 }
 0x88d   : > { %v4076_v4 = vpop.eup %4075 }
 0x88e   : > { %v1749_v5 = vsel %vm1215_vm2, %v4076_v4, 0.0 }
 0x88f   : > { %v4078_v6 = vpop.eup %4077  ;;  %1750 = vadd.xlane.f32.xlu0 %v1749_v5 }
 0x890   : > { %v1752_v7 = vsel %vm1215_vm2, %v4078_v6, 0.0 }
 0x891   : > { %1753 = vadd.xlane.f32.xlu1 %v1752_v7 }
 0x8a2   : > { %1818 = vrot.lane.b32.xlu1 %v4778_v50, %s4362_s29 }
 0x8a6   : > { %1888 = vrot.lane.b32.xlu1 %v4772_v39, %s4363_s28 }
 0x8a9   : > { %v1733_v8 = vpop.xlane.xlu0 %1732 }
 0x8aa   : > { %v1739_v9 = vsub.f32 %v1719_v49, %v1733_v8 }
 0x8ac   : > { %v1745_v10 = vmul.f32 1.442695, %v1739_v9 }
 0x8ad   : > { %v1736_v11 = vpop.xlane.xlu0 %1735 }
 0x8ae   : > { %4079 = vpow2.f32 %v1745_v10  ;;  %v1740_v12 = vsub.f32 %v1722_v54, %v1736_v11 }
 0x8b0   : > { %v1747_v14 = vmul.f32 1.442695, %v1740_v12 }
 0x8b2   : > { %4081 = vpow2.f32 %v1747_v14 }
 0x8b8   : > { %v4080_v13 = vpop.eup %4079 }
 0x8b9   : > { %v1755_v15 = vsel %vm1215_vm2, %v4080_v13, 0.0 }
 0x8ba   : > { %1756 = vadd.xlane.f32.xlu0 %v1755_v15 }
 0x8bc   : > { %v4082_v16 = vpop.eup %4081 }
 0x8bd   : > { %v1758_v18 = vsel %vm1215_vm2, %v4082_v16, 0.0 }
 0x8ca   : > { %1759 = vadd.xlane.f32.xlu1 %v1758_v18 }
 0x8d0   : > { %1771 = vrot.lane.b32.xlu0 %v4780_v53, %s4362_s29 }
 0x8d4   : > { %1886 = vrot.lane.b32.xlu0 %v4774_v41, %s4363_s28 }
 0x8db   : > { %1939 = vrot.lane.b32.xlu1 %v4785_v61, %s4363_s28 }
 0x8df   : > { %1937 = vrot.lane.b32.xlu1 %v4787_v62, %s4363_s28 }
 0x91c   : > { %v1751_v23 = vpop.xlane.xlu0 %1750 }
 0x91e   : > { %v1754_v39 = vpop.xlane.xlu1 %1753 }
 0x91f   : > { %4083 = vrcp.f32 %v1754_v39 }
 0x920   : > { %4085 = vrcp.f32 %v1751_v23 }
 0x922   : > { %v1819_v21 = vpop.permute.xlu1 %1818 }
 0x923   : > { %3796 = vmatpush3.bf16.msra.mxu0 %v1819_v21 }
 0x924   : > { %3807 = vmatprep.subr.bf16.mxu0 %v4359_v17 }
 0x926   : > { %v1889_v61 = vpop.permute.xlu1 %1888 }
 0x927   : > { %v1894_v62 = vsel %vm1120_vm1, %v1889_v61, 0 }
 0x929   : > { %v4084_v25 = vpop.eup %4083 }
 0x92a   : > { %v4086_v27 = vpop.eup %4085  ;;  %v1766_v28 = vmul.f32 %v4084_v25, %v4078_v6 }
 0x92b   : > { %v1765_v30 = vmul.f32 %v4086_v27, %v4076_v4 }
 0x92d   : > { %v1769_v32 = vpack.c.bf16 %v1766_v28, %v1765_v30 }
 0x947   : > { %v1757_v26 = vpop.xlane.xlu0 %1756 }
 0x948   : > { %4087 = vrcp.f32 %v1757_v26 }
 0x94b   : > { %v1772_v41 = vpop.permute.xlu0 %1771 }
 0x94c   : > { %3790 = vmatpush3.bf16.msra.mxu1 %v1772_v41 }
 0x94d   : > { %3801 = vmatprep.subr.bf16.mxu1 %v4359_v17 }
 0x94f   : > { %3792 = vmatmul.mubr.msk.bf16.vlgmr.msra.gmra.mrb[20].mxu1 %vm1215_vm2, %v1769_v32  ;;  %v1887_v34 = vpop.permute.xlu0 %1886 }
 0x950   : > { %3803 = vmatprep.mubr.msk.bf16.mxu1 %vm4360_vm0, %v4359_v17 }
 0x952   : > { %v4088_v35 = vpop.eup %4087 }
 0x953   : > { %v1767_v37 = vmul.f32 %v4088_v35, %v4080_v13 }
 0x955   : > { %3802 = vmatpush3.bf16.xpose.msra.mxu1 %v1894_v62 }
 0x956   : > { %3813 = vmatprep.subr.bf16.mxu1 %v4359_v17 }
 0x957   : > { %v1760_v33 = vpop.xlane.xlu1 %1759 }
 0x958   : > { %4089 = vrcp.f32 %v1760_v33 }
 0x95b   : > { %v1940_v40 = vpop.permute.xlu1 %1939 }
 0x95c   : > { %3804 = vmatmul.mubr.msk.bf16.vlgmr.msra.gmra.mrb[24].mxu1 %vm1120_vm1, %v1887_v34  ;;  %v1945_v45 = vsel %vm1120_vm1, %v1940_v40, 0 }
 0x95d   : > { %3815 = vmatprep.mubr.msk.bf16.mxu1 %vm4360_vm0, %v4359_v17 }
 0x95f   : > { %v1938_v47 = vpop.permute.xlu1 %1937 }
 0x962   : > { %v4090_v36 = vpop.eup %4089 }
 0x963   : > { %v1768_v38 = vmul.f32 %v4090_v36, %v4082_v16 }
 0x965   : > { %v1770_v42 = vpack.c.bf16 %v1768_v38, %v1767_v37 }
 0x967   : > { %3798 = vmatmul.mubr.msk.bf16.vlgmr.msra.gmra.mrb[32].mxu0 %vm1215_vm2, %v1770_v42 }
 0x968   : > { %3808 = vmatpush3.bf16.xpose.msra.mxu0 %v1945_v45  ;;  %3809 = vmatprep.mubr.msk.bf16.mxu0 %vm4360_vm0, %v4359_v17 }
 0x969   : > { %3819 = vmatprep.subr.bf16.mxu0 %v4359_v17 }
 0x96f   : > { %3810 = vmatmul.mubr.msk.bf16.vlgmr.msra.gmra.mrb[36].mxu0 %vm1120_vm1, %v1938_v47 }
 0x970   : > { %3821 = vmatprep.mubr.msk.bf16.mxu0 %vm4360_vm0, %v4359_v17 }
 0xa22   : > { %v1811_v48 = vpop.f32.mrb[20].mxu1 }
 0xa23   : > { %v3793_v49 = vpop.f32.mrb[21].mxu1 }
 0xa24   : > { %v1814_v51 = vpop.f32.mrb[22].mxu1 }
 0xa25   : > { %v3794_v52 = vpop.f32.mrb[23].mxu1 }
 0xa2f   : > { %v1930_v54 = vpop.f32.mrb[24].mxu1 }
 0xa30   : > { %v1931_v55 = vadd.f32 %v1930_v54, %v4805_v0  ;;  %v3805_v56 = vpop.f32.mrb[25].mxu1 }
 0xa31   : > { %v1933_v57 = vpop.f32.mrb[26].mxu1 }
 0xa32   : > { %v1934_v58 = vadd.f32 %v1933_v57, %v4810_v2  ;;  %v3806_v59 = vpop.f32.mrb[27].mxu1  ;;  %v1988_v60 = vsel %vm1215_vm2, %v1931_v55, -inf }
 0xa33   : > { %1989 = vmax.xlane.f32.xlu0 %v1988_v60  ;;  %v3947_v59 = vld [vmem:[%s4624_s26] sm:$0xff]   ;;  %v3948_v60 = vld [vmem:[%s4624_s26 + $0x8] sm:$0xff]  }
 0xa34   : > { %v1991_v63 = vsel %vm1215_vm2, %v1934_v58, -inf }
 0xa35   : > { %1992 = vmax.xlane.f32.xlu1 %v1991_v63  ;;  %v3949_v63 = vld [vmem:[%s4624_s26 + $0x10] sm:$0xff]  }
 0xa3a   : > { %v1858_v1 = vpop.f32.mrb[32].mxu0 }
 0xa3b   : > { %v3799_v17 = vpop.f32.mrb[33].mxu0 }
 0xa3c   : > { %v1861_v3 = vpop.f32.mrb[34].mxu0  ;;  %v3951_v17 = vld [vmem:[%s4624_s26 + $0x20] sm:$0xff]  }
 0xa3d   : > { %v3800_v4 = vpop.f32.mrb[35].mxu0 }
 0xa42   : > { %v1981_v5 = vpop.f32.mrb[36].mxu0 }
 0xa43   : > { %v1982_v6 = vadd.f32 %v1981_v5, %v4805_v0  ;;  %v3811_v7 = vpop.f32.mrb[37].mxu0 }
 0xa44   : > { %v1984_v8 = vpop.f32.mrb[38].mxu0  ;;  %v3953_v7 = vld [vmem:[%s4624_s26 + $0x30] sm:$0xff]  }
 0xa45   : > { %v1985_v9 = vadd.f32 %v1984_v8, %v4810_v2  ;;  %v3812_v10 = vpop.f32.mrb[39].mxu0  ;;  %v1994_v11 = vsel %vm1215_vm2, %v1982_v6, -inf }
 0xa46   : > { %1995 = vmax.xlane.f32.xlu0 %v1994_v11 }
 0xa47   : > { %v1997_v12 = vsel %vm1215_vm2, %v1985_v9, -inf }
 0xa4a   : > { %1998 = vmax.xlane.f32.xlu0 %v1997_v12 }
 0xac0   : > { %v1990_v13 = vpop.xlane.xlu0 %1989 }
 0xac1   : > { %v2000_v14 = vsub.f32 %v1931_v55, %v1990_v13 }
 0xac2   : > { %v1993_v15 = vpop.xlane.xlu1 %1992 }
 0xac3   : > { %v2004_v16 = vmul.f32 1.442695, %v2000_v14  ;;  %v2001_v18 = vsub.f32 %v1934_v58, %v1993_v15 }
 0xac5   : > { %4091 = vpow2.f32 %v2004_v16  ;;  %v2006_v39 = vmul.f32 1.442695, %v2001_v18 }
 0xac7   : > { %4093 = vpow2.f32 %v2006_v39 }
 0xacf   : > { %v4092_v0 = vpop.eup %4091 }
 0xad0   : > { %v2012_v21 = vsel %vm1215_vm2, %v4092_v0, 0.0 }
 0xad1   : > { %v4094_v23 = vpop.eup %4093  ;;  %2013 = vadd.xlane.f32.xlu0 %v2012_v21 }
 0xad2   : > { %v2015_v2 = vsel %vm1215_vm2, %v4094_v23, 0.0 }
 0xad3   : > { %2016 = vadd.xlane.f32.xlu1 %v2015_v2  ;;  %v1996_v25 = vpop.xlane.xlu0 %1995 }
 0xad4   : > { %v2002_v26 = vsub.f32 %v1982_v6, %v1996_v25 }
 0xad6   : > { %v2008_v27 = vmul.f32 1.442695, %v2002_v26  ;;  %v3499_v26 = vld [vmem:[%s5310_s14] ss:$0 sm:$0xff] }
 0xad7   : > { %v1999_v28 = vpop.xlane.xlu0 %1998 }
 0xad8   : > { %4095 = vpow2.f32 %v2008_v27  ;;  %v2003_v30 = vsub.f32 %v1985_v9, %v1999_v28  ;;  %v3954_v9 = vld [vmem:[%s4624_s26 + $0x38] sm:$0xff]  }
 0xada   : > { %v2010_v41 = vmul.f32 1.442695, %v2003_v30 }
 0xadc   : > { %4097 = vpow2.f32 %v2010_v41 }
 0xae2   : > { %v4096_v32 = vpop.eup %4095 }
 0xae3   : > { %v2018_v61 = vsel %vm1215_vm2, %v4096_v32, 0.0 }
 0xae4   : > { %2019 = vadd.xlane.f32.xlu0 %v2018_v61 }
 0xae6   : > { %v4098_v62 = vpop.eup %4097 }
 0xae7   : > { %v2021_v33 = vsel %vm1215_vm2, %v4098_v62, 0.0 }
 0xae8   : > { %2022 = vadd.xlane.f32.xlu1 %v2021_v33 }
 0xaf9   : > { %2081 = vrot.lane.b32.xlu1 %v4778_v50, %s4363_s28 }
 0xafa   : > { %2034 = vrot.lane.b32.xlu0 %v4780_v53, %s4363_s28 }
 0xafd   : > { %1606 = vrot.lane.b32.xlu1 %v4894_v29, %s4363_s28 }
 0xafe   : > { %1610 = vrot.lane.b32.xlu0 %v4902_v44, %s4363_s28 }
 0xb01   : > { %1608 = vrot.lane.b32.xlu1 %v4896_v31, %s4363_s28 }
 0xb02   : > { %1869 = vrot.lane.b32.xlu0 %v1811_v48, %s4362_s29 }
 0xb05   : > { %1612 = vrot.lane.b32.xlu1 %v4904_v46, %s4363_s28 }
 0xb06   : > { %1873 = vrot.lane.b32.xlu0 %v1858_v1, %s4362_s29  ;;  %v3950_v1 = vld [vmem:[%s4624_s26 + $0x18] sm:$0xff]  }
 0xb09   : > { %1871 = vrot.lane.b32.xlu1 %v1814_v51, %s4362_s29 }
 0xb0d   : > { %1875 = vrot.lane.b32.xlu1 %v1861_v3, %s4362_s29  ;;  %v3952_v3 = vld [vmem:[%s4624_s26 + $0x28] sm:$0xff]  }
 0xb5e   : > { %v2014_v53 = vpop.xlane.xlu0 %2013 }
 0xb60   : > { %v2017_v50 = vpop.xlane.xlu1 %2016 }
 0xb61   : > { %4099 = vrcp.f32 %v2017_v50 }
 0xb62   : > { %4101 = vrcp.f32 %v2014_v53  ;;  %v4180_v53 = vld [vmem:[#allocation2 + $0x8] sm:$0xff] }
 0xb6b   : > { %v4100_v29 = vpop.eup %4099 }
 0xb6c   : > { %v4102_v34 = vpop.eup %4101  ;;  %v2029_v35 = vmul.f32 %v4100_v29, %v4094_v23 }
 0xb6d   : > { %v2028_v31 = vmul.f32 %v4102_v34, %v4092_v0 }
 0xb6f   : > { %v2032_v46 = vpack.c.bf16 %v2029_v35, %v2028_v31  ;;  %v4182_v31 = vld [vmem:[#allocation2 + $0x18] sm:$0xff] }
 0xb71   : > { %v2020_v44 = vpop.xlane.xlu0 %2019 }
 0xb72   : > { %4103 = vrcp.f32 %v2020_v44  ;;  %v4181_v44 = vld [vmem:[#allocation2 + $0x10] sm:$0xff] }
 0xb75   : > { %v2023_v36 = vpop.xlane.xlu1 %2022  ;;  %v2035_v37 = vpop.permute.xlu0 %2034 }
 0xb76   : > { %4105 = vrcp.f32 %v2023_v36  ;;  %3814 = vmatpush3.bf16.msra.mxu1 %v2035_v37  ;;  %v3955_v37 = vld [vmem:[%s4631_s23] ss:$16 sps:$4 sm:$0xff]  }
 0xb77   : > { %3825 = vmatprep.subr.bf16.mxu1 %v3947_v59 }
 0xb79   : > { %v2082_v38 = vpop.permute.xlu1 %2081  ;;  %3816 = vmatmul.mubr.msk.bf16.vlgmr.msra.gmra.mrb[28].mxu1 %vm1215_vm2, %v2032_v46  ;;  %v1611_v40 = vpop.permute.xlu0 %1610  ;;  %v3957_v46 = vld [vmem:[%s4631_s23 + $0x4] ss:$16 sps:$4 sm:$0xff]  }
 0xb7a   : > { %1621 = vst.msk [vmem:[#allocation3 + $0x10] sm:$0xff] %vm1618_vm3, %v1611_v40  ;;  %3820 = vmatpush3.bf16.msra.mxu0 %v2082_v38  ;;  %3826 = vmatpush3.bf16.msra.mxu1 %v3947_v59  ;;  %v3958_v38 = vld [vmem:[%s4631_s23 + $0x8] ss:$16 sps:$4 sm:$0xff]   ;;  %v3960_v40 = vld [vmem:[%s4631_s23 + $0xc] ss:$16 sps:$4 sm:$0xff]  }
 0xb7b   : > { %3827 = vmatprep.subr.bf16.mxu1 %v3948_v60  ;;  %2561 = vmatprep.subr.bf16.mxu0 %v3957_v46 }
 0xb7c   : > { %v4104_v47 = vpop.eup %4103 }
 0xb7d   : > { %v1607_v42 = vpop.permute.xlu1 %1606  ;;  %v1870_v45 = vpop.permute.xlu0 %1869  ;;  %v2030_v49 = vmul.f32 %v4104_v47, %v4096_v32  ;;  %v3961_v47 = vld [vmem:[%s4631_s23 + $0x20] ss:$16 sps:$4 sm:$0xff]  }
 0xb7e   : > { %1619 = vst.msk [vmem:[#allocation3] sm:$0xff] %vm1618_vm3, %v1607_v42  ;;  %3828 = vmatpush3.bf16.msra.mxu1 %v3948_v60  ;;  %v3963_v42 = vld [vmem:[%s4631_s23 + $0x24] ss:$16 sps:$4 sm:$0xff]  }
 0xb7f   : > { %1882 = vst.msk [vmem:[#allocation3] sm:$0xff] %vm1881_vm4, %v1870_v45  ;;  %3829 = vmatprep.subr.bf16.mxu1 %v3949_v63  ;;  %v3966_v45 = vld [vmem:[%s4631_s23 + $0x2c] ss:$16 sps:$4 sm:$0xff]  }
 0xb80   : > { %v4106_v48 = vpop.eup %4105 }
 0xb81   : > { %v2031_v51 = vmul.f32 %v4106_v48, %v4098_v62  ;;  %v1609_v52 = vpop.permute.xlu1 %1608  ;;  %v1874_v54 = vpop.permute.xlu0 %1873  ;;  %v4179_v62 = vld [vmem:[#allocation2] sm:$0xff]  ;;  %v3964_v48 = vld [vmem:[%s4631_s23 + $0x28] ss:$16 sps:$4 sm:$0xff]  }
 0xb82   : > { %1620 = vst.msk [vmem:[#allocation3 + $0x8] sm:$0xff] %vm1618_vm3, %v1609_v52  ;;  %3830 = vmatpush3.bf16.msra.mxu1 %v3949_v63 }
 0xb83   : > { %1884 = vst.msk [vmem:[#allocation3 + $0x10] sm:$0xff] %vm1881_vm4, %v1874_v54  ;;  %v2033_v55 = vpack.c.bf16 %v2031_v51, %v2030_v49  ;;  %3831 = vmatprep.subr.bf16.mxu1 %v3950_v1 }
 0xb85   : > { %v1613_v56 = vpop.permute.xlu1 %1612  ;;  %3822 = vmatmul.mubr.msk.bf16.vlgmr.msra.gmra.mrb[40].mxu0 %vm1215_vm2, %v2033_v55 }
 0xb86   : > { %1622 = vst.msk [vmem:[#allocation3 + $0x18] sm:$0xff] %vm1618_vm3, %v1613_v56  ;;  %2593 = vmatprep.mubr.bf16.mxu0 %v4358_v43  ;;  %3832 = vmatpush3.bf16.msra.mxu1 %v3950_v1 }
 0xb87   : > { %3833 = vmatprep.subr.bf16.mxu1 %v3951_v17  ;;  %2562 = vmatpush1.bf16.msra.mxu0 %v3955_v37 }
 0xb88   : > { %2563 = vmatprep.subr.bf16.mxu0 %v3963_v42 }
 0xb89   : > { %v1872_v57 = vpop.permute.xlu1 %1871 }
 0xb8a   : > { %1883 = vst.msk [vmem:[#allocation3 + $0x8] sm:$0xff] %vm1881_vm4, %v1872_v57  ;;  %3834 = vmatpush3.bf16.msra.mxu1 %v3951_v17 }
 0xb8b   : > { %3835 = vmatprep.subr.bf16.mxu1 %v3952_v3  ;;  %2564 = vmatpush1.bf16.msra.mxu0 %v3961_v47  ;;  %v3508_v47 = vld [vmem:[%s5311_s15] ss:$0 sm:$0xff] }
 0xb8d   : > { %v1876_v58 = vpop.permute.xlu1 %1875 }
 0xb8e   : > { %1885 = vst.msk [vmem:[#allocation3 + $0x18] sm:$0xff] %vm1881_vm4, %v1876_v58  ;;  %3836 = vmatpush3.bf16.msra.mxu1 %v3952_v3 }
 0xb8f   : > { %3837 = vmatprep.subr.bf16.mxu1 %v3953_v7 }
 0xb92   : > { %3838 = vmatpush3.bf16.msra.mxu1 %v3953_v7  ;;  %v3972_v7 = vld [vmem:[%s4631_s23 + $0x4c] ss:$16 sps:$4 sm:$0xff]  }
 0xb93   : > { %3839 = vmatprep.subr.bf16.mxu1 %v3954_v9 }
 0xb96   : > { %3840 = vmatpush3.bf16.msra.mxu1 %v3954_v9  ;;  %v3970_v9 = vld [vmem:[%s4631_s23 + $0x48] ss:$16 sps:$4 sm:$0xff]  }
 0xb97   : > { %2614 = vmatprep.subr.bf16.mxu1 %v3960_v40 }
 0xc4c   : > { %v2074_v4 = vpop.f32.mrb[28].mxu1 }
 0xc4d   : > { %2132 = vrot.lane.b32.xlu0 %v2074_v4, %s4361_s17  ;;  %v3817_v5 = vpop.f32.mrb[29].mxu1 }
 0xc4e   : > { %v2077_v6 = vpop.f32.mrb[30].mxu1 }
 0xc4f   : > { %2134 = vrot.lane.b32.xlu1 %v2077_v6, %s4361_s17  ;;  %v3818_v8 = vpop.f32.mrb[31].mxu1  ;;  %v3969_v6 = vld [vmem:[%s4631_s23 + $0x44] ss:$16 sps:$4 sm:$0xff]  }
 0xc50   : > { %v3967_v8 = vld [vmem:[%s4631_s23 + $0x40] ss:$16 sps:$4 sm:$0xff]   ;;  %2565 = vmatprep.subr.bf16.mxu0 %v3969_v6 }
 0xc51   : > { %2566 = vmatpush1.bf16.msra.mxu0 %v3967_v8  ;;  %v4003_v8 = vld [vmem:[%s4683_s21 + $0x40] sm:$0xff]  }
 0xc58   : > { %v2121_v10 = vpop.f32.mrb[40].mxu0 }
 0xc59   : > { %2136 = vrot.lane.b32.xlu0 %v2121_v10, %s4361_s17  ;;  %v3823_v11 = vpop.f32.mrb[41].mxu0  ;;  %v3975_v10 = vld [vmem:[%s4631_s23 + $0x64] ss:$16 sps:$4 sm:$0xff]  }
 0xc5a   : > { %v2124_v12 = vpop.f32.mrb[42].mxu0  ;;  %v3978_v11 = vld [vmem:[%s4631_s23 + $0x6c] ss:$16 sps:$4 sm:$0xff]   ;;  %2567 = vmatprep.subr.bf16.mxu0 %v3975_v10  ;;  %v4006_v10 = vld [vmem:[%s4683_s21 + $0x80] sm:$0xff]  }
 0xc5b   : > { %2138 = vrot.lane.b32.xlu1 %v2124_v12, %s4361_s17  ;;  %v3824_v13 = vpop.f32.mrb[43].mxu0  ;;  %v3973_v12 = vld [vmem:[%s4631_s23 + $0x60] ss:$16 sps:$4 sm:$0xff]   ;;  %s5314_s17 = sld [smem:[#allocation24_spill]] (!%p3591_p7) }
 0xc5c   : > { %v3976_v13 = vld [vmem:[%s4631_s23 + $0x68] ss:$16 sps:$4 sm:$0xff]   ;;  %2568 = vmatpush1.bf16.msra.mxu0 %v3973_v12 }
 0xc5d   : > { %v4009_v12 = vld [vmem:[%s4683_s21 + $0x8] sm:$0xff]  }
 0xcbf   : > { %v2133_v14 = vpop.permute.xlu0 %2132 }
 0xcc0   : > { %2145 = vst.msk [vmem:[#allocation3] sm:$0xff] %vm2144_vm5, %v2133_v14  ;;  %v3981_v14 = vld [vmem:[%s4631_s23 + $0x84] ss:$16 sps:$4 sm:$0xff]  }
 0xcc1   : > { %v2135_v15 = vpop.permute.xlu1 %2134  ;;  %2569 = vmatprep.subr.bf16.mxu0 %v3981_v14  ;;  %v4011_v14 = vld [vmem:[%s4683_s21 + $0x50] sm:$0xff]  }
 0xcc2   : > { %2146 = vst.msk [vmem:[#allocation3 + $0x8] sm:$0xff] %vm2144_vm5, %v2135_v15  ;;  %v3984_v15 = vld [vmem:[%s4631_s23 + $0x8c] ss:$16 sps:$4 sm:$0xff]  }
 0xcc7   : > { %v2149_v16 = vld [vmem:[#allocation3] sm:$0xff] }
 0xcc9   : > { %v2150_v18 = vld [vmem:[#allocation3 + $0x8] sm:$0xff] }
 0xcca   : > { %v2153_v39 = vpack.c.bf16 %v2150_v18, %v2149_v16  ;;  %v3979_v16 = vld [vmem:[%s4631_s23 + $0x80] ss:$16 sps:$4 sm:$0xff]   ;;  %v3982_v18 = vld [vmem:[%s4631_s23 + $0x88] ss:$16 sps:$4 sm:$0xff]  }
 0xccb   : > { %v2137_v0 = vpop.permute.xlu0 %2136  ;;  %2570 = vmatpush1.bf16.msra.mxu0 %v3979_v16  ;;  %v4013_v16 = vld [vmem:[%s4683_s21 + $0x10] sm:$0xff]  }
 0xccc   : > { %2147 = vst.msk [vmem:[#allocation3 + $0x10] sm:$0xff] %vm2144_vm5, %v2137_v0  ;;  %3841 = vmatprep.mubr.bf16.mxu1 %v2153_v39  ;;  %v3987_v39 = vld [vmem:[%s4631_s23 + $0xa4] ss:$16 sps:$4 sm:$0xff]   ;;  %v3990_v0 = vld [vmem:[%s4631_s23 + $0xac] ss:$16 sps:$4 sm:$0xff]  }
 0xccd   : > { %v2139_v21 = vpop.permute.xlu1 %2138  ;;  %2571 = vmatprep.subr.bf16.mxu0 %v3987_v39  ;;  %v4015_v39 = vld [vmem:[%s4683_s21 + $0x58] sm:$0xff]  }
 0xcce   : > { %2148 = vst.msk [vmem:[#allocation3 + $0x18] sm:$0xff] %vm2144_vm5, %v2139_v21  ;;  %v3985_v21 = vld [vmem:[%s4631_s23 + $0xa0] ss:$16 sps:$4 sm:$0xff]  }
 0xccf   : > { %2572 = vmatpush1.bf16.msra.mxu0 %v3985_v21  ;;  %v4017_v21 = vld [vmem:[%s4683_s21 + $0x18] sm:$0xff]  }
 0xcd3   : > { %v2151_v23 = vld [vmem:[#allocation3 + $0x10] sm:$0xff] }
 0xcd5   : > { %v2152_v2 = vld [vmem:[#allocation3 + $0x18] sm:$0xff] }
 0xcd6   : > { %v2154_v25 = vpack.c.bf16 %v2152_v2, %v2151_v23  ;;  %v3988_v23 = vld [vmem:[%s4631_s23 + $0xa8] ss:$16 sps:$4 sm:$0xff]   ;;  %v3993_v2 = vld [vmem:[%s4631_s23 + $0xc4] ss:$16 sps:$4 sm:$0xff]  }
 0xcd7   : > { %2573 = vmatprep.subr.bf16.mxu0 %v3993_v2  ;;  %v4019_v2 = vld [vmem:[%s4683_s21 + $0x60] sm:$0xff]  }
 0xcd8   : > { %3842 = vmatmul.mubr.bf16.vlgmr.msra.gmra.mrb[32].mxu1 %v2154_v25  ;;  %v3996_v25 = vld [vmem:[%s4631_s23 + $0xcc] ss:$16 sps:$4 sm:$0xff]  }
 0xcd9   : > { %2646 = vmatprep.mubr.bf16.mxu1 %v4358_v43  ;;  %2615 = vmatpush1.bf16.msra.mxu1 %v3958_v38 }
 0xcda   : > { %2616 = vmatprep.subr.bf16.mxu1 %v3966_v45 }
 0xcdd   : > { %2617 = vmatpush1.bf16.msra.mxu1 %v3964_v48 }
 0xcde   : > { %2618 = vmatprep.subr.bf16.mxu1 %v3972_v7 }
 0xce1   : > { %2619 = vmatpush1.bf16.msra.mxu1 %v3970_v9  ;;  %v4005_v9 = vld [vmem:[%s4683_s21] sm:$0xff]  }
 0xce2   : > { %2620 = vmatprep.subr.bf16.mxu1 %v3978_v11  ;;  %v4008_v11 = vld [vmem:[%s4683_s21 + $0xc8] sm:$0xff]  }
 0xce5   : > { %2621 = vmatpush1.bf16.msra.mxu1 %v3976_v13  ;;  %v4010_v13 = vld [vmem:[%s4683_s21 + $0x88] sm:$0xff]  }
 0xce6   : > { %2622 = vmatprep.subr.bf16.mxu1 %v3984_v15  ;;  %v4012_v15 = vld [vmem:[%s4683_s21 + $0xd0] sm:$0xff]  }
 0xce9   : > { %2623 = vmatpush1.bf16.msra.mxu1 %v3982_v18  ;;  %v4014_v18 = vld [vmem:[%s4683_s21 + $0x90] sm:$0xff]  }
 0xcea   : > { %2624 = vmatprep.subr.bf16.mxu1 %v3990_v0  ;;  %v4016_v0 = vld [vmem:[%s4683_s21 + $0xd8] sm:$0xff]  }
 0xced   : > { %2625 = vmatpush1.bf16.msra.mxu1 %v3988_v23  ;;  %v4018_v23 = vld [vmem:[%s4683_s21 + $0x98] sm:$0xff]  }
 0xcee   : > { %2626 = vmatprep.subr.bf16.mxu1 %v3996_v25  ;;  %v4020_v25 = vld [vmem:[%s4683_s21 + $0xe0] sm:$0xff]  }
 0xdab   : > { %v3843_v27 = vpop.f32.mrb[32].mxu1 }
 0xdac   : > { %v2260_v28 = vpop.f32.mrb[33].mxu1  ;;  %v2269_v61 = vadd.f32 %v3843_v27, %v3499_v26  ;;  %v3994_v27 = vld [vmem:[%s4631_s23 + $0xc8] ss:$16 sps:$4 sm:$0xff]  }
 0xdad   : > { %v2261_v30 = vadd.f32 %v3499_v26, %v2260_v28  ;;  %v3844_v41 = vpop.f32.mrb[34].mxu1  ;;  %v3999_v28 = vld [vmem:[%s4631_s23 + $0xe4] ss:$16 sps:$4 sm:$0xff]   ;;  %2627 = vmatpush1.bf16.msra.mxu1 %v3994_v27 }
 0xdae   : > { %v2263_v32 = vpop.f32.mrb[35].mxu1  ;;  %v5006_v34 = vadd.f32 %v4181_v44, %v2269_v61  ;;  %v2272_v35 = vadd.f32 %v3844_v41, %v3499_v26  ;;  %v3997_v41 = vld [vmem:[%s4631_s23 + $0xe0] ss:$16 sps:$4 sm:$0xff]  }
 0xdaf   : > { %v5001_v33 = vadd.f32 %v4179_v62, %v2261_v30  ;;  %v2264_v50 = vadd.f32 %v3499_v26, %v2263_v32  ;;  %v3991_v26 = vld [vmem:[%s4631_s23 + $0xc0] ss:$16 sps:$4 sm:$0xff]   ;;  %v4002_v30 = vld [vmem:[%s4631_s23 + $0xec] ss:$16 sps:$4 sm:$0xff]   ;;  %v4000_v32 = vld [vmem:[%s4631_s23 + $0xe8] ss:$16 sps:$4 sm:$0xff]  }
 0xdb0   : > { %v5010_v36 = vadd.f32 %v4182_v31, %v2272_v35  ;;  %2574 = vmatpush1.bf16.msra.mxu0 %v3991_v26  ;;  %2628 = vmatprep.subr.bf16.mxu1 %v4002_v30  ;;  %v4021_v26 = vld [vmem:[%s4683_s21 + $0x20] sm:$0xff]   ;;  %v4024_v30 = vld [vmem:[%s4683_s21 + $0xe8] sm:$0xff]  }
 0xdb1   : > { %v5003_v29 = vadd.f32 %v4180_v53, %v2264_v50  ;;  %2281 = vadd.xlane.f32.xlu0 %v5001_v33  ;;  %2575 = vmatprep.subr.bf16.mxu0 %v3999_v28  ;;  %v4022_v27 = vld [vmem:[%s4683_s21 + $0xa0] sm:$0xff]   ;;  %v4023_v28 = vld [vmem:[%s4683_s21 + $0x68] sm:$0xff]  }
 0xdb2   : > { %2629 = vmatpush1.bf16.msra.mxu1 %v4000_v32  ;;  %v4026_v32 = vld [vmem:[%s4683_s21 + $0xa8] sm:$0xff]  }
 0xdb3   : > { %2283 = vadd.xlane.f32.xlu1 %v5003_v29 }
 0xdb4   : > { %2576 = vmatpush1.bf16.msra.mxu0 %v3997_v41  ;;  %v4025_v41 = vld [vmem:[%s4683_s21 + $0x28] sm:$0xff]  }
 0xdb5   : > { %2285 = vadd.xlane.f32.xlu0 %v5006_v34  ;;  %3653 = vmatprep.subr.bf16.mxu0 %v4003_v8 }
 0xdb9   : > { %2287 = vadd.xlane.f32.xlu0 %v5010_v36 }
 0xe3e   : > { %v2282_v49 = vpop.xlane.xlu0 %2281 }
 0xe3f   : > { %v2289_v51 = vmul.f32 0.0078125, %v2282_v49 }
 0xe40   : > { %v2284_v52 = vpop.xlane.xlu1 %2283 }
 0xe41   : > { %v5022_v54 = vsub.f32 %v5001_v33, %v2289_v51  ;;  %v2290_v55 = vmul.f32 0.0078125, %v2284_v52 }
 0xe42   : > { %v2286_v56 = vpop.xlane.xlu0 %2285 }
 0xe43   : > { %v5025_v57 = vsub.f32 %v5003_v29, %v2290_v55  ;;  %v2291_v58 = vmul.f32 0.0078125, %v2286_v56  ;;  %v2297_v59 = vmul.f32 %v5022_v54, %v5022_v54  ;;  %v3509_v56 = vld [vmem:[%s735_s30] ss:$0 sm:$0xff] }
 0xe45   : > { %v5030_v60 = vsub.f32 %v5006_v34, %v2291_v58  ;;  %2301 = vadd.xlane.f32.xlu0 %v2297_v59  ;;  %v2298_v63 = vmul.f32 %v5025_v57, %v5025_v57 }
 0xe46   : > { %v2288_v1 = vpop.xlane.xlu0 %2287 }
 0xe47   : > { %v2292_v17 = vmul.f32 0.0078125, %v2288_v1  ;;  %2303 = vadd.xlane.f32.xlu1 %v2298_v63  ;;  %v2299_v3 = vmul.f32 %v5030_v60, %v5030_v60 }
 0xe49   : > { %v5037_v4 = vsub.f32 %v5010_v36, %v2292_v17  ;;  %2305 = vadd.xlane.f32.xlu0 %v2299_v3 }
 0xe4b   : > { %v2300_v5 = vmul.f32 %v5037_v4, %v5037_v4 }
 0xe4d   : > { %2307 = vadd.xlane.f32.xlu1 %v2300_v5 }
 0xed2   : > { %v2302_v61 = vpop.xlane.xlu0 %2301 }
 0xed3   : > { %v2309_v62 = vmul.f32 0.0078125, %v2302_v61  ;;  %v4027_v61 = vld [vmem:[%s4683_s21 + $0x70] sm:$0xff]  }
 0xed4   : > { %v2304_v50 = vpop.xlane.xlu1 %2303 }
 0xed5   : > { %v2313_v53 = vadd.f32 1e-05, %v2309_v62  ;;  %v2310_v44 = vmul.f32 0.0078125, %v2304_v50  ;;  %v4028_v62 = vld [vmem:[%s4683_s21 + $0xf0] sm:$0xff]  }
 0xed6   : > { %v2306_v35 = vpop.xlane.xlu0 %2305  ;;  %v4029_v50 = vld [vmem:[%s4683_s21 + $0x30] sm:$0xff]  }
 0xed7   : > { %4107 = vrsqrt.f32 %v2313_v53  ;;  %v2314_v31 = vadd.f32 1e-05, %v2310_v44  ;;  %v2311_v37 = vmul.f32 0.0078125, %v2306_v35  ;;  %v4030_v53 = vld [vmem:[%s4683_s21 + $0xb0] sm:$0xff]   ;;  %v4031_v44 = vld [vmem:[%s4683_s21 + $0x78] sm:$0xff]  }
 0xed8   : > { %v4032_v35 = vld [vmem:[%s4683_s21 + $0xf8] sm:$0xff]  }
 0xed9   : > { %4109 = vrsqrt.f32 %v2314_v31  ;;  %v2315_v46 = vadd.f32 1e-05, %v2311_v37  ;;  %v4033_v31 = vld [vmem:[%s4683_s21 + $0x38] sm:$0xff]  }
 0xeda   : > { %v2308_v38 = vpop.xlane.xlu1 %2307  ;;  %v4034_v37 = vld [vmem:[%s4683_s21 + $0xb8] sm:$0xff]  }
 0xedb   : > { %4111 = vrsqrt.f32 %v2315_v46  ;;  %v2312_v40 = vmul.f32 0.0078125, %v2308_v38  ;;  %v2379_v46 = vld [vmem:[%s4677_s27] sm:$0xf]  ;;  %v2395_v38 = vsub.s32 3, %v4760_v19 }
 0xedd   : > { %v2316_v42 = vadd.f32 1e-05, %v2312_v40  ;;  %v2384_v40 = vrot.slane %v2379_v46, %v865_v20 }
 0xedf   : > { %4113 = vrsqrt.f32 %v2316_v42  ;;  %v5119_v42 = vrot.slane %v2379_v46, %v873_v24 }
 0xee1   : > { %v4108_v45 = vpop.eup %4107 }
 0xee2   : > { %v2321_v48 = vmul.f32 %v4108_v45, %v5022_v54  ;;  %v5123_v45 = vrot.slane %v2379_v46, %v869_v22 }
 0xee3   : > { %v4110_v49 = vpop.eup %4109 }
 0xee4   : > { %v2322_v51 = vmul.f32 %v4110_v49, %v5025_v57  ;;  %v2331_v52 = vmul.f32 %v3508_v47, %v2321_v48 }
 0xee5   : > { %v4112_v55 = vpop.eup %4111 }
 0xee6   : > { %v2332_v58 = vmul.f32 %v3508_v47, %v2322_v51  ;;  %v2341_v59 = vadd.f32 %v3509_v56, %v2331_v52  ;;  %v2323_v1 = vmul.f32 %v4112_v55, %v5030_v60 }
 0xee8   : > { %v2342_v63 = vadd.f32 %v3509_v56, %v2332_v58  ;;  %v2333_v3 = vmul.f32 %v3508_v47, %v2323_v1 }
 0xee9   : > { %v4114_v17 = vpop.eup %4113 }
 0xeea   : > { %v2345_v54 = vpack.c.bf16 %v2342_v63, %v2341_v59  ;;  %v2324_v57 = vmul.f32 %v4114_v17, %v5037_v4  ;;  %v2343_v60 = vadd.f32 %v3509_v56, %v2333_v3  ;;  %v4004_v4 = vld [vmem:[%s4683_s21 + $0xc0] sm:$0xff]  }
 0xeeb   : > { %3681 = vmatprep.subr.bf16.mxu1 %v4004_v4 }
 0xeec   : > { %2594 = vmatmul.mubr.bf16.vlgmr.msra.gmra.mrb[44].mxu0 %v2345_v54  ;;  %2647 = vmatmul.mubr.bf16.vlgmr.msra.gmra.mrb[36].mxu1 %v2345_v54  ;;  %v2334_v5 = vmul.f32 %v3508_v47, %v2324_v57  ;;  %v5125_v47 = vrot.slane %v2379_v46, %v2395_v38 }
 0xeed   : > { %2603 = vmatprep.mubr.bf16.mxu0 %v4358_v43  ;;  %2656 = vmatprep.mubr.bf16.mxu1 %v4358_v43  ;;  %v4007_v43 = vld [vmem:[%s4683_s21 + $0x48] sm:$0xff]  }
 0xeee   : > { %v2344_v6 = vadd.f32 %v3509_v56, %v2334_v5  ;;  %3654 = vmatpush3.bf16.msra.mxu0 %v4005_v9  ;;  %3682 = vmatpush3.bf16.msra.mxu1 %v4006_v10 }
 0xeef   : > { %3655 = vmatprep.subr.bf16.mxu0 %v4007_v43  ;;  %3683 = vmatprep.subr.bf16.mxu1 %v4008_v11 }
 0xef0   : > { %v2346_v7 = vpack.c.bf16 %v2344_v6, %v2343_v60 }
 0xef2   : > { %3656 = vmatpush3.bf16.msra.mxu0 %v4009_v12  ;;  %3684 = vmatpush3.bf16.msra.mxu1 %v4010_v13 }
 0xef3   : > { %3657 = vmatprep.subr.bf16.mxu0 %v4011_v14  ;;  %3685 = vmatprep.subr.bf16.mxu1 %v4012_v15 }
 0xef4   : > { %2604 = vmatmul.mubr.bf16.gmra.mrb[48].mxu0 %v2346_v7  ;;  %2657 = vmatmul.mubr.bf16.gmra.mrb[40].mxu1 %v2346_v7 }
 0xef6   : > { %3658 = vmatpush3.bf16.msra.mxu0 %v4013_v16  ;;  %3686 = vmatpush3.bf16.msra.mxu1 %v4014_v18 }
 0xef7   : > { %3659 = vmatprep.subr.bf16.mxu0 %v4015_v39  ;;  %3687 = vmatprep.subr.bf16.mxu1 %v4016_v0 }
 0xefa   : > { %3660 = vmatpush3.bf16.msra.mxu0 %v4017_v21  ;;  %3688 = vmatpush3.bf16.msra.mxu1 %v4018_v23 }
 0xefb   : > { %3661 = vmatprep.subr.bf16.mxu0 %v4019_v2  ;;  %3689 = vmatprep.subr.bf16.mxu1 %v4020_v25 }
 0xefe   : > { %3662 = vmatpush3.bf16.msra.mxu0 %v4021_v26  ;;  %3690 = vmatpush3.bf16.msra.mxu1 %v4022_v27 }
 0xeff   : > { %3663 = vmatprep.subr.bf16.mxu0 %v4023_v28  ;;  %3691 = vmatprep.subr.bf16.mxu1 %v4024_v30 }
 0xf02   : > { %3664 = vmatpush3.bf16.msra.mxu0 %v4025_v41  ;;  %3692 = vmatpush3.bf16.msra.mxu1 %v4026_v32 }
 0xf03   : > { %3665 = vmatprep.subr.bf16.mxu0 %v4027_v61  ;;  %3693 = vmatprep.subr.bf16.mxu1 %v4028_v62 }
 0xf06   : > { %3666 = vmatpush3.bf16.msra.mxu0 %v4029_v50  ;;  %3694 = vmatpush3.bf16.msra.mxu1 %v4030_v53 }
 0xf07   : > { %3667 = vmatprep.subr.bf16.mxu0 %v4031_v44  ;;  %3695 = vmatprep.subr.bf16.mxu1 %v4032_v35 }
 0xf0a   : > { %3668 = vmatpush3.bf16.msra.mxu0 %v4033_v31  ;;  %3696 = vmatpush3.bf16.msra.mxu1 %v4034_v37 }
 0xfbf   : > { %v2595_v48 = vpop.f32.mrb[44].mxu0  ;;  %v2648_v49 = vpop.f32.mrb[36].mxu1 }
 0xfc0   : > { %v5127_v51 = vadd.f32 %v2595_v48, %v2384_v40  ;;  %v5130_v52 = vadd.f32 %v2648_v49, %v5119_v42  ;;  %v2597_v55 = vpop.f32.mrb[45].mxu0  ;;  %v2650_v56 = vpop.f32.mrb[37].mxu1 }
 0xfc1   : > { %v5133_v20 = vadd.f32 %v2597_v55, %v5123_v45  ;;  %v5136_v24 = vadd.f32 %v2650_v56, %v5125_v47  ;;  %v2599_v19 = vpop.f32.mrb[46].mxu0  ;;  %v2652_v22 = vpop.f32.mrb[38].mxu1 }
 0xfc2   : > { %v3542_v58 = vmul.f32 -1.702, %v5127_v51  ;;  %v3544_v59 = vmul.f32 -1.702, %v5130_v52  ;;  %v5140_v63 = vadd.f32 %v2599_v19, %v2384_v40  ;;  %v5143_v1 = vadd.f32 %v2652_v22, %v5119_v42  ;;  %v2601_v17 = vpop.f32.mrb[47].mxu0  ;;  %v2654_v54 = vpop.f32.mrb[39].mxu1 }
 0xfc3   : > { %v3543_v57 = vmul.f32 -1.702, %v5133_v20  ;;  %v3545_v3 = vmul.f32 -1.702, %v5136_v24  ;;  %v5148_v5 = vadd.f32 %v2601_v17, %v5123_v45  ;;  %v5151_v6 = vadd.f32 %v2654_v54, %v5125_v47 }
 0xfc4   : > { %v2699_v60 = vmul.f32 1.442695, %v3542_v58  ;;  %v2703_v7 = vmul.f32 1.442695, %v3544_v59  ;;  %v3546_v8 = vmul.f32 -1.702, %v5140_v63 }
 0xfc5   : > { %v2701_v4 = vmul.f32 1.442695, %v3543_v57  ;;  %v2705_v9 = vmul.f32 1.442695, %v3545_v3  ;;  %v3548_v10 = vmul.f32 -1.702, %v5143_v1 }
 0xfc6   : > { %4115 = vpow2.f32 %v2699_v60  ;;  %v2707_v43 = vmul.f32 1.442695, %v3546_v8  ;;  %v3547_v11 = vmul.f32 -1.702, %v5148_v5  ;;  %v3549_v12 = vmul.f32 -1.702, %v5151_v6 }
 0xfc7   : > { %4117 = vpow2.f32 %v2703_v7  ;;  %v2711_v13 = vmul.f32 1.442695, %v3548_v10  ;;  %v2605_v14 = vpop.f32.mrb[48].mxu0  ;;  %v2658_v15 = vpop.f32.mrb[40].mxu1 }
 0xfc8   : > { %4119 = vpow2.f32 %v2701_v4  ;;  %v2709_v16 = vmul.f32 1.442695, %v3547_v11  ;;  %v5157_v18 = vadd.f32 %v2605_v14, %v2384_v40  ;;  %v2607_v39 = vpop.f32.mrb[49].mxu0  ;;  %v2660_v0 = vpop.f32.mrb[41].mxu1  ;;  %v2713_v21 = vmul.f32 1.442695, %v3549_v12 }
 0xfc9   : > { %4121 = vpow2.f32 %v2705_v9  ;;  %v5160_v23 = vadd.f32 %v2658_v15, %v5119_v42  ;;  %v5163_v2 = vadd.f32 %v2607_v39, %v5123_v45  ;;  %v2609_v25 = vpop.f32.mrb[50].mxu0  ;;  %v2662_v26 = vpop.f32.mrb[42].mxu1  ;;  %v5172_v31 = vadd.f32 %v2660_v0, %v5125_v47 }
 0xfca   : > { %4123 = vpow2.f32 %v2707_v43  ;;  %v3550_v27 = vmul.f32 -1.702, %v5157_v18  ;;  %v5166_v28 = vadd.f32 %v2609_v25, %v2384_v40  ;;  %v2611_v30 = vpop.f32.mrb[51].mxu0  ;;  %v2664_v41 = vpop.f32.mrb[43].mxu1  ;;  %v5176_v58 = vadd.f32 %v2662_v26, %v5119_v42 }
 0xfcb   : > { %4125 = vpow2.f32 %v2711_v13  ;;  %v3552_v32 = vmul.f32 -1.702, %v5160_v23  ;;  %v3551_v61 = vmul.f32 -1.702, %v5163_v2  ;;  %v3553_v56 = vmul.f32 -1.702, %v5172_v31 }
 0xfcc   : > { %4127 = vpow2.f32 %v2709_v16  ;;  %v2715_v62 = vmul.f32 1.442695, %v3550_v27  ;;  %v3554_v50 = vmul.f32 -1.702, %v5166_v28  ;;  %v5179_v54 = vadd.f32 %v2611_v30, %v5123_v45 }
 0xfcd   : > { %4129 = vpow2.f32 %v2713_v21  ;;  %v2719_v53 = vmul.f32 1.442695, %v3552_v32  ;;  %v2717_v44 = vmul.f32 1.442695, %v3551_v61  ;;  %v5182_v60 = vadd.f32 %v2664_v41, %v5125_v47 }
 0xfce   : > { %4131 = vpow2.f32 %v2715_v62  ;;  %v2723_v35 = vmul.f32 1.442695, %v3554_v50  ;;  %v2721_v4 = vmul.f32 1.442695, %v3553_v56  ;;  %v3556_v10 = vmul.f32 -1.702, %v5176_v58 }
 0xfcf   : > { %4133 = vpow2.f32 %v2719_v53  ;;  %v3555_v45 = vmul.f32 -1.702, %v5179_v54  ;;  %v3557_v12 = vmul.f32 -1.702, %v5182_v60 }
 0xfd0   : > { %v4116_v37 = vpop.eup %4115  ;;  %4135 = vpow2.f32 %v2717_v44  ;;  %v2727_v14 = vmul.f32 1.442695, %v3556_v10 }
 0xfd1   : > { %v4118_v46 = vpop.eup %4117  ;;  %v2731_v38 = vadd.f32 1.0, %v4116_v37  ;;  %4137 = vpow2.f32 %v2723_v35  ;;  %v2725_v39 = vmul.f32 1.442695, %v3555_v45  ;;  %v2729_v21 = vmul.f32 1.442695, %v3557_v12 }
 0xfd2   : > { %v4120_v40 = vpop.eup %4119  ;;  %v2733_v48 = vadd.f32 1.0, %v4118_v46 }
 0xfd3   : > { %v4122_v49 = vpop.eup %4121  ;;  %4139 = vrcp.f32 %v2731_v38  ;;  %v2732_v55 = vadd.f32 1.0, %v4120_v40 }
 0xfd4   : > { %v4124_v19 = vpop.eup %4123  ;;  %4141 = vrcp.f32 %v2733_v48  ;;  %v2734_v22 = vadd.f32 1.0, %v4122_v49 }
 0xfd5   : > { %v4126_v59 = vpop.eup %4125  ;;  %4143 = vrcp.f32 %v2732_v55  ;;  %v2735_v17 = vadd.f32 1.0, %v4124_v19 }
 0xfd6   : > { %v4128_v57 = vpop.eup %4127  ;;  %4145 = vrcp.f32 %v2734_v22  ;;  %v2737_v3 = vadd.f32 1.0, %v4126_v59 }
 0xfd7   : > { %v4130_v7 = vpop.eup %4129  ;;  %4147 = vrcp.f32 %v2735_v17  ;;  %v2736_v8 = vadd.f32 1.0, %v4128_v57 }
 0xfd8   : > { %v4132_v9 = vpop.eup %4131  ;;  %4149 = vrcp.f32 %v2737_v3  ;;  %v2738_v42 = vadd.f32 1.0, %v4130_v7 }
 0xfd9   : > { %4151 = vrcp.f32 %v2736_v8  ;;  %v2739_v43 = vadd.f32 1.0, %v4132_v9  ;;  %v4134_v11 = vpop.eup %4133 }
 0xfda   : > { %4153 = vrcp.f32 %v2738_v42  ;;  %v4136_v13 = vpop.eup %4135  ;;  %v2741_v48 = vadd.f32 1.0, %v4134_v11 }
 0xfdb   : > { %4155 = vpow2.f32 %v2721_v4  ;;  %v4138_v47 = vpop.eup %4137  ;;  %v2740_v55 = vadd.f32 1.0, %v4136_v13 }
 0xfdc   : > { %4157 = vrcp.f32 %v2739_v43  ;;  %v2743_v16 = vadd.f32 1.0, %v4138_v47 }
 0xfdd   : > { %v4140_v15 = vpop.eup %4139 }
 0xfde   : > { %v4142_v0 = vpop.eup %4141  ;;  %4159 = vrcp.f32 %v2743_v16  ;;  %v2779_v41 = vmul.f32 %v4140_v15, %v5127_v51 }
 0xfdf   : > { %v4144_v25 = vpop.eup %4143  ;;  %4161 = vpow2.f32 %v2727_v14  ;;  %v2781_v62 = vmul.f32 %v4142_v0, %v5130_v52 }
 0xfe0   : > { %v4146_v26 = vpop.eup %4145  ;;  %4163 = vpow2.f32 %v2725_v39  ;;  %v2780_v44 = vmul.f32 %v4144_v25, %v5133_v20 }
 0xfe1   : > { %v4148_v27 = vpop.eup %4147  ;;  %4165 = vpow2.f32 %v2729_v21  ;;  %v2782_v38 = vmul.f32 %v4146_v26, %v5136_v24 }
 0xfe2   : > { %v4150_v30 = vpop.eup %4149  ;;  %v2783_v32 = vmul.f32 %v4148_v27, %v5140_v63  ;;  %4167 = vrcp.f32 %v2741_v48 }
 0xfe3   : > { %v4152_v61 = vpop.eup %4151  ;;  %v2785_v50 = vmul.f32 %v4150_v30, %v5143_v1  ;;  %4169 = vrcp.f32 %v2740_v55 }
 0xfe4   : > { %v4154_v53 = vpop.eup %4153  ;;  %v2795_v35 = vpack.c.bf16 %v2783_v32, %v2779_v41  ;;  %v2784_v37 = vmul.f32 %v4152_v61, %v5148_v5 }
 0xfe5   : > { %v4156_v46 = vpop.eup %4155  ;;  %v2797_v40 = vpack.c.bf16 %v2785_v50, %v2781_v62  ;;  %v2786_v51 = vmul.f32 %v4154_v53, %v5151_v6 }
 0xfe6   : > { %v2796_v63 = vpack.c.bf16 %v2784_v37, %v2780_v44  ;;  %v4158_v49 = vpop.eup %4157  ;;  %v2742_v52 = vadd.f32 1.0, %v4156_v46 }
 0xfe7   : > { %v2798_v56 = vpack.c.bf16 %v2786_v51, %v2782_v38  ;;  %v2787_v19 = vmul.f32 %v4158_v49, %v5157_v18 }
 0xfe8   : > { %3098 = vmatprep.mubr.bf16.mxu0 %v2796_v63  ;;  %v4160_v1 = vpop.eup %4159  ;;  %4171 = vrcp.f32 %v2742_v52 }
 0xfe9   : > { %3147 = vmatprep.mubr.bf16.mxu1 %v2798_v56  ;;  %3099 = vmatmul.mubr.bf16.vlgmr.msra.gmra.mrb[52].mxu0 %v2795_v35  ;;  %v4162_v20 = vpop.eup %4161  ;;  %v2791_v5 = vmul.f32 %v4160_v1, %v5166_v28 }
 0xfea   : > { %3148 = vmatmul.mubr.bf16.vlgmr.msra.gmra.mrb[44].mxu1 %v2797_v40  ;;  %v4164_v24 = vpop.eup %4163  ;;  %v2745_v6 = vadd.f32 1.0, %v4162_v20 }
 0xfeb   : > { %v4166_v22 = vpop.eup %4165  ;;  %v2744_v59 = vadd.f32 1.0, %v4164_v24  ;;  %v2799_v17 = vpack.c.bf16 %v2791_v5, %v2787_v19 }
 0xfec   : > { %4173 = vrcp.f32 %v2745_v6  ;;  %v2746_v57 = vadd.f32 1.0, %v4166_v22  ;;  %v4168_v3 = vpop.eup %4167 }
 0xfed   : > { %4175 = vrcp.f32 %v2744_v59  ;;  %v4170_v7 = vpop.eup %4169  ;;  %v2789_v9 = vmul.f32 %v4168_v3, %v5160_v23 }
 0xfee   : > { %4177 = vrcp.f32 %v2746_v57  ;;  %v2788_v10 = vmul.f32 %v4170_v7, %v5163_v2  ;;  %v3558_v2 = vld [vmem:[%s742_s0] ss:$0 sm:$0xff] }
 0xff2   : > { %v4172_v8 = vpop.eup %4171 }
 0xff3   : > { %v2790_v45 = vmul.f32 %v4172_v8, %v5172_v31 }
 0xff6   : > { %v4174_v4 = vpop.eup %4173 }
 0xff7   : > { %v4176_v18 = vpop.eup %4175  ;;  %v2793_v28 = vmul.f32 %v4174_v4, %v5176_v58 }
 0xff8   : > { %v4178_v42 = vpop.eup %4177  ;;  %v2792_v43 = vmul.f32 %v4176_v18, %v5179_v54 }
 0xff9   : > { %v2794_v11 = vmul.f32 %v4178_v42, %v5182_v60  ;;  %v2801_v12 = vpack.c.bf16 %v2793_v28, %v2789_v9 }
 0xffa   : > { %v2800_v13 = vpack.c.bf16 %v2792_v43, %v2788_v10 }
 0xffb   : > { %v2802_v47 = vpack.c.bf16 %v2794_v11, %v2790_v45 }
 0xffc   : > { %3106 = vmatprep.mubr.bf16.mxu0 %v2800_v13 }
 0xffd   : > { %3155 = vmatprep.mubr.bf16.mxu1 %v2802_v47  ;;  %3107 = vmatmul.mubr.bf16.gmra.mrb[56].mxu0 %v2799_v17 }
 0xffe   : > { %3156 = vmatmul.mubr.bf16.gmra.mrb[48].mxu1 %v2801_v12 }
0x10bc   : > { %v3669_v23 = vpop.f32.mrb[52].mxu0 }
0x10bd   : > { %v3697_v14 = vpop.f32.mrb[44].mxu1  ;;  %v3670_v58 = vpop.f32.mrb[53].mxu0 }
0x10be   : > { %v3671_v54 = vadd.f32 %v3670_v58, %v3669_v23  ;;  %v3698_v15 = vpop.f32.mrb[45].mxu1  ;;  %v3672_v31 = vpop.f32.mrb[54].mxu0 }
0x10bf   : > { %v3699_v16 = vadd.f32 %v3698_v15, %v3697_v14  ;;  %v3700_v60 = vpop.f32.mrb[46].mxu1  ;;  %v3673_v39 = vpop.f32.mrb[55].mxu0 }
0x10c0   : > { %v3101_v0 = vadd.f32 %v3671_v54, %v3558_v2  ;;  %v3674_v21 = vadd.f32 %v3673_v39, %v3672_v31  ;;  %v3701_v25 = vpop.f32.mrb[47].mxu1  ;;  %v3593_v54 = vld [vmem:[%s5314_s17] ss:$0 sm:$0xff] (!%p3591_p7) }
0x10c1   : > { %v3702_v26 = vadd.f32 %v3701_v25, %v3700_v60 }
0x10c2   : > { %v3150_v27 = vadd.f32 %v3699_v16, %v3101_v0  ;;  %v3104_v30 = vadd.f32 %v3674_v21, %v3558_v2 }
0x10c4   : > { %v3164_v41 = vadd.f32 %v3150_v27, %v5001_v33  ;;  %v3153_v32 = vadd.f32 %v3702_v26, %v3104_v30 }
0x10c6   : > { %3168 = vst [vmem:[#allocation2] sm:$0xff] %v3164_v41  ;;  %v3165_v61 = vadd.f32 %v3153_v32, %v5003_v29  ;;  %3178 = vadd.xlane.f32.xlu0 (!%p3591_p7), %v3164_v41 }
0x10c8   : > { %3169 = vst [vmem:[#allocation2 + $0x8] sm:$0xff] %v3165_v61 }
0x10ca   : > { %3180 = vadd.xlane.f32.xlu0 (!%p3591_p7), %v3165_v61 }
0x10d0   : > { %v3675_v62 = vpop.f32.mrb[56].mxu0 }
0x10d1   : > { %v3703_v50 = vpop.f32.mrb[48].mxu1  ;;  %v3676_v53 = vpop.f32.mrb[57].mxu0 }
0x10d2   : > { %v3677_v44 = vadd.f32 %v3676_v53, %v3675_v62  ;;  %v3704_v35 = vpop.f32.mrb[49].mxu1  ;;  %v3678_v37 = vpop.f32.mrb[58].mxu0 }
0x10d3   : > { %v3705_v46 = vadd.f32 %v3704_v35, %v3703_v50  ;;  %v3706_v38 = vpop.f32.mrb[50].mxu1  ;;  %v3679_v40 = vpop.f32.mrb[59].mxu0 }
0x10d4   : > { %v3109_v51 = vadd.f32 %v3677_v44, %v3558_v2  ;;  %v3680_v48 = vadd.f32 %v3679_v40, %v3678_v37  ;;  %v3707_v63 = vpop.f32.mrb[51].mxu1 }
0x10d5   : > { %v3708_v49 = vadd.f32 %v3707_v63, %v3706_v38 }
0x10d6   : > { %v3158_v55 = vadd.f32 %v3705_v46, %v3109_v51  ;;  %v3112_v33 = vadd.f32 %v3680_v48, %v3558_v2  ;;  %3175 = sbr.rel (%p3591_p7) target bundleno = 4630 (0x1216), region = 104  ;;  %v3592_v2 = vld [vmem:[%s5313_s24] ss:$0 sm:$0xff] (!%p3591_p7) }
0x10d8   : > { %v3166_v56 = vadd.f32 %v3158_v55, %v5006_v34  ;;  %v3161_v52 = vadd.f32 %v3708_v49, %v3112_v33 }
0x10da   : > { %3170 = vst [vmem:[#allocation2 + $0x10] sm:$0xff] %v3166_v56  ;;  %v3167_v29 = vadd.f32 %v3161_v52, %v5010_v36  ;;  %3182 = vadd.xlane.f32.xlu1 (!%p3591_p7), %v3166_v56 }
0x10dc   : > { %3171 = vst [vmem:[#allocation2 + $0x18] sm:$0xff] %v3167_v29 }
0x10de   : > { %3184 = vadd.xlane.f32.xlu1 %v3167_v29 }
0x1153   : > { %v3179_v1 = vpop.xlane.xlu0 %3178 }
0x1154   : > { %v3186_v19 = vmul.f32 0.0078125, %v3179_v1 }
0x1156   : > { %v3190_v24 = vsub.f32 %v3164_v41, %v3186_v19 }
0x1157   : > { %v3181_v22 = vpop.xlane.xlu0 %3180 }
0x1158   : > { %v3187_v59 = vmul.f32 0.0078125, %v3181_v22  ;;  %v3194_v17 = vmul.f32 %v3190_v24, %v3190_v24 }
0x115a   : > { %v3191_v36 = vsub.f32 %v3165_v61, %v3187_v59  ;;  %3198 = vadd.xlane.f32.xlu0 %v3194_v17 }
0x115c   : > { %v3195_v8 = vmul.f32 %v3191_v36, %v3191_v36 }
0x115e   : > { %3200 = vadd.xlane.f32.xlu1 %v3195_v8 }
0x1167   : > { %v3183_v20 = vpop.xlane.xlu1 %3182 }
0x1168   : > { %v3188_v5 = vmul.f32 0.0078125, %v3183_v20 }
0x116a   : > { %v3192_v6 = vsub.f32 %v3166_v56, %v3188_v5 }
0x116b   : > { %v3185_v34 = vpop.xlane.xlu1 %3184 }
0x116c   : > { %v3189_v57 = vmul.f32 0.0078125, %v3185_v34  ;;  %v3196_v7 = vmul.f32 %v3192_v6, %v3192_v6 }
0x116e   : > { %v3193_v3 = vsub.f32 %v3167_v29, %v3189_v57  ;;  %3202 = vadd.xlane.f32.xlu0 %v3196_v7 }
0x1170   : > { %v3197_v4 = vmul.f32 %v3193_v3, %v3193_v3 }
0x1172   : > { %3204 = vadd.xlane.f32.xlu1 %v3197_v4 }
0x11e7   : > { %v3199_v18 = vpop.xlane.xlu0 %3198 }
0x11e8   : > { %v3206_v9 = vmul.f32 0.0078125, %v3199_v18 }
0x11ea   : > { %v3210_v28 = vadd.f32 1e-05, %v3206_v9 }
0x11eb   : > { %v3201_v42 = vpop.xlane.xlu1 %3200 }
0x11ec   : > { %4183 = vrsqrt.f32 %v3210_v28  ;;  %v3207_v43 = vmul.f32 0.0078125, %v3201_v42 }
0x11ee   : > { %v3211_v11 = vadd.f32 1e-05, %v3207_v43 }
0x11f0   : > { %4185 = vrsqrt.f32 %v3211_v11 }
0x11f6   : > { %v4184_v14 = vpop.eup %4183 }
0x11f7   : > { %v3218_v58 = vmul.f32 %v4184_v14, %v3190_v24 }
0x11f9   : > { %v3228_v15 = vmul.f32 %v3592_v2, %v3218_v58 }
0x11fa   : > { %v4186_v31 = vpop.eup %4185 }
0x11fb   : > { %v3203_v10 = vpop.xlane.xlu0 %3202  ;;  %v3238_v60 = vadd.f32 %v3593_v54, %v3228_v15  ;;  %v3219_v39 = vmul.f32 %v4186_v31, %v3191_v36 }
0x11fc   : > { %v3208_v45 = vmul.f32 0.0078125, %v3203_v10 }
0x11fd   : > { %3242 = vst [vmem:[#allocation10] sm:$0xff] %v3238_v60  ;;  %v3229_v21 = vmul.f32 %v3592_v2, %v3219_v39 }
0x11fe   : > { %v3212_v12 = vadd.f32 1e-05, %v3208_v45 }
0x11ff   : > { %v3205_v13 = vpop.xlane.xlu1 %3204  ;;  %v3239_v27 = vadd.f32 %v3593_v54, %v3229_v21 }
0x1200   : > { %v3209_v47 = vmul.f32 0.0078125, %v3205_v13  ;;  %4187 = vrsqrt.f32 %v3212_v12 }
0x1201   : > { %3243 = vst [vmem:[#allocation10 + $0x8] sm:$0xff] %v3239_v27 }
0x1202   : > { %v3213_v23 = vadd.f32 1e-05, %v3209_v47 }
0x1204   : > { %4189 = vrsqrt.f32 %v3213_v23 }
0x120a   : > { %v4188_v16 = vpop.eup %4187 }
0x120b   : > { %v3220_v0 = vmul.f32 %v4188_v16, %v3192_v6 }
0x120d   : > { %v3230_v26 = vmul.f32 %v3592_v2, %v3220_v0 }
0x120e   : > { %v4190_v25 = vpop.eup %4189 }
0x120f   : > { %v3221_v30 = vmul.f32 %v4190_v25, %v3193_v3  ;;  %v3240_v41 = vadd.f32 %v3593_v54, %v3230_v26 }
0x1211   : > { %v3231_v32 = vmul.f32 %v3592_v2, %v3221_v30  ;;  %3244 = vst [vmem:[#allocation10 + $0x10] sm:$0xff] %v3240_v41 }
0x1213   : > { %v3241_v61 = vadd.f32 %v3593_v54, %v3231_v32 }
0x1215   : > { %3245 = vst [vmem:[#allocation10 + $0x18] sm:$0xff] %v3241_v61 }
0x1216 PF: > { %p3868_p12 = scmp.eq.s32.totalorder %s4471_s25, 1  ;;  %s4364_s29 = smov [#allocation10]  }
0x1217   : > { %s3252_s28 = sshll.u32 %s4364_s29, 4  ;;  %s3253_s28 = int_to_ptr.vmem [resolvable:$true] %s3252_s28 }
0x1218   : > { %s4281_s26 = scalar_lea.vmem %s3253_s28, 512  ;;  %p4288_p6 = scmp.lt.s32.totalorder %s3253_s28, %s3253_s28 }
0x1219   : > { %p4282_p2 = scmp.ne.s32.totalorder %s3253_s28, %s4281_s26  ;;  %p4289_p1 = scmp.lt.s32.totalorder %s4281_s26, %s4281_s26 }
0x121b   : > { %p4283_p3 = pnand %p4282_p2, %p3868_p12  ;;  %p4290_p4 = por %p4289_p1, %p4288_p6 }
0x121d   : > { %p4284_p5 = pneg %p4283_p3 }
0x121f   : > { %p4291_p11 = pnand %p4290_p4, %p4284_p5 }
0x1221   : > { %4294 = shalt.err (!%p4291_p11)
}
0x1222   : > { %s5315_s23 = sld [smem:[#allocation25_spill]] }
0x1228   : > { %s5316_s6 = smov %s5315_s23  ;;  %s4295_s15 = scalar_lea.hbm %s5315_s23, 512 }
0x1229   : > { %p4296_p13 = scmp.ne.s32.totalorder %s5316_s6, %s4295_s15  ;;  %p4301_p8 = scmp.lt.u32.totalorder %s4295_s15, %s5316_s6 }
0x122b   : > { %p4297_p10 = pnand %p4296_p13, %p3868_p12 }
0x122d   : > { %p4298_p9 = pneg %p4297_p10 }
0x122f   : > { %p4303_p0 = pnand %p4301_p8, %p4298_p9 }
0x1231   : > { %4306 = shalt.err (!%p4303_p0)
}
0x1232   : > { %s4365_s21 = smov 128   ;;  %s4366_s13 = smov 8  }
0x1233   : > { %3854 = dma.vmem_to_hbm [thread:$0]  (%p3868_p12), %s3253_s28, 512, %s5316_s6, [#allocation6], %s4365_s21, %s4365_s21, %s4366_s13  }
0x1234   : > { %4332 = dma.done.wait (%p3868_p12), [#allocation6], 512  }
0x1235   : > { %4334 = vsyncadd (%p3868_p12), [#allocation6], 4294966784 }
0x1236 PF: > { %s5317_s24 = sld [smem:[#allocation15_spill]]  ;;  %s5318_s16 = sld [smem:[#allocation14_spill]] }
0x1237   : > { %s5319_s23 = sld [smem:[#allocation16_spill]]  ;;  %s5320_s21 = smov %s4341_s22 }
0x123c   : > { %p30_p7 = scmp.ge.s32.totalorder %s5317_s24, 4   ;;  %s5321_s22 = smov %s5318_s16 }
0x123e   :  { %32 = sbr.rel (!%p30_p7) target bundleno = 16 (0x10), region = 180 }
0x1245   :  { %3268 = vsyncpa [#allocation5], 1 }
0x1246   :  { %3270 = vsyncpa [#allocation5 + $0x1], 1 }
0x1247   :  { %3271 = vsyncpa [#allocation8], 1 }
0x1248   :  { %3273 = vsyncpa [#allocation8 + $0x1], 1 }
0x1249   :  { %3274 = vsyncpa [#allocation6], 1 }
0x124a   :  { %3276 = vsyncpa [#allocation6 + $0x1], 1 }

</bundles_post_ra>
